<compile_context>
chip_gen: v6e
topology: v6e:2x2x1
jax: 0.10.0
libtpu: 0.0.40
codegen_flags: <defaults>
</compile_context>

<pallas_src>
import functools
import numpy as np
import jax
import jax.numpy as jnp
from jax.experimental import pallas as pl
from jax.experimental.pallas import tpu as pltpu


# ----------------------------------------------------------------------------
# Parameter packing helpers
# ----------------------------------------------------------------------------
def _pack_pieces(pieces, dtype=jnp.float32, align=8):
    """Stack 2-D pieces into one slab at `align`-row offsets (width = max width)."""
    width = max(int(a.shape[1]) for _, a in pieces)
    layout, off = {}, 0
    for name, a in pieces:
        r, c = int(a.shape[0]), int(a.shape[1])
        layout[name] = (off, r, c)
        off += -(-r // align) * align
    rows = max(8, -(-off // 8) * 8)
    slab = np.zeros((rows, width), np.float32)
    for name, a in pieces:
        o, r, c = layout[name]
        slab[o:o + r, 0:c] = np.asarray(a, np.float32)
    return jnp.asarray(slab, dtype), layout


def pack_gnn_weights(params, D, M):
    """Fuse the 4 units (and/not x strc/func) into block-diagonal wide weights.

    Unit order u = 0..3: [and_strc, not_strc, and_func, not_func].
      w1  : (2D, 4M)   rows = [x | hf]  (hf rows zero for strc columns)
      w2  : (4M, 4M)   block diagonal
      w3  : (4M, 4D)   block diagonal        -> msg  (bn, 4D)
      wih : (4D, 12D)  block diagonal, cols ordered [r(4D) | z(4D) | n(4D)]
      whh : (4D, 12D)  same layout (driven by h_cat = [hs|hs|hf|hf])
    Weights -> one bf16 slab; biases -> one f32 slab.
    """
    units = [('and', 'strc'), ('not', 'strc'), ('and', 'func'), ('not', 'func')]
    D4, M4 = 4 * D, 4 * M
    W1 = np.zeros((2 * D, M4), np.float32)
    B1 = np.zeros((1, M4), np.float32)
    W2 = np.zeros((M4, M4), np.float32)
    B2 = np.zeros((1, M4), np.float32)
    W3 = np.zeros((M4, D4), np.float32)
    B3 = np.zeros((1, D4), np.float32)
    WIH = np.zeros((D4, 3 * D4), np.float32)
    WHH = np.zeros((D4, 3 * D4), np.float32)
    BR = np.zeros((1, D4), np.float32)
    BZ = np.zeros((1, D4), np.float32)
    BIN = np.zeros((1, D4), np.float32)
    BHN = np.zeros((1, D4), np.float32)

    for u, (tag, path) in enumerate(units):
        w1, b1, w2, b2, w3, b3 = [np.asarray(a, np.float32)
                                  for a in params[f'aggr_{tag}_{path}']]
        cm, cd = slice(u * M, (u + 1) * M), slice(u * D, (u + 1) * D)
        if path == 'strc':
            W1[0:D, cm] = w1                      # only x feeds the strc path
        else:
            W1[0:D, cm] = w1[:D]                  # [x, hf] without host concat
            W1[D:2 * D, cm] = w1[D:]
        B1[:, cm] = b1
        W2[cm, cm] = w2
        B2[:, cm] = b2
        W3[cm, cd] = w3
        B3[:, cd] = b3

        wih, whh, bih, bhh = [np.asarray(a, np.float32)
                              for a in params[f'update_{tag}_{path}']]
        for g, sl in enumerate((slice(0, D), slice(D, 2 * D), slice(2 * D, 3 * D))):  # r,z,n
            WIH[cd, g * D4 + u * D: g * D4 + (u + 1) * D] = wih[:, sl]
            WHH[cd, g * D4 + u * D: g * D4 + (u + 1) * D] = whh[:, sl]
        BR[:, cd] = bih[:, 0:D] + bhh[:, 0:D]            # r/z biases merged (legal)
        BZ[:, cd] = bih[:, D:2 * D] + bhh[:, D:2 * D]
        BIN[:, cd] = bih[:, 2 * D:3 * D]                 # n biases kept separate
        BHN[:, cd] = bhh[:, 2 * D:3 * D]

    w_slab, w_layout = _pack_pieces(
        [('w1', W1), ('w2', W2), ('w3', W3), ('wih', WIH), ('whh', WHH)],
        dtype=jnp.bfloat16, align=16)                    # 16-row align: bf16 tiles
    b_slab, b_layout = _pack_pieces(
        [('b1', B1), ('b2', B2), ('b3', B3), ('br', BR), ('bz', BZ),
         ('bin', BIN), ('bhn', BHN)],
        dtype=jnp.float32, align=1)                      # co-located 1-row biases
    return w_slab, w_layout, b_slab, b_layout


def pack_readout_weights(rparams, pad_out=128):
    """Fold BatchNorm1d (eval) into the preceding Linear, pad the last layer to
    128 output lanes (lane-dense stores), pack into one f32 slab."""
    (w1, b1, s1, t1, w2, b2, s2, t2, w3, b3) = [np.asarray(a, np.float32) for a in rparams]
    w1 = w1 * s1; b1 = b1 * s1 + t1
    w2 = w2 * s2; b2 = b2 * s2 + t2
    dout = int(w3.shape[1])
    w3p = np.zeros((w3.shape[0], pad_out), np.float32); w3p[:, :dout] = w3
    b3p = np.zeros((1, pad_out), np.float32);           b3p[:, :dout] = b3
    slab, layout = _pack_pieces([('w1', w1), ('b1', b1), ('w2', w2), ('b2', b2),
                                 ('w3', w3p), ('b3', b3p)], dtype=jnp.float32, align=8)
    return slab, layout, dout


# ----------------------------------------------------------------------------
# Block sizing (generation aware: v7x 64 MiB VMEM / 2 TCs, v5e/v6e 128 MiB / 1 TC)
# ----------------------------------------------------------------------------
def _vmem_bytes():
    try:
        return int(pltpu.get_tpu_info().vmem_capacity_bytes)
    except Exception:
        return 64 << 20        # conservative (v7x) fallback


def _choose_block_rows(n, row_bytes, cap=2048):
    budget = _vmem_bytes() // 6                 # headroom for double-buffered inputs
    cap = int(max(256, min(cap, budget // max(row_bytes, 1))))
    n8 = max(8, -(-n // 8) * 8)
    if n8 >= 512:
        # >=2 row blocks (>=256 rows each) so the "parallel" axis shards across
        # both v7x TensorCores; on v5e/v6e the serial loop cost is negligible.
        half = -(-((n8 + 1) // 2) // 8) * 8
        return int(min(cap, half))
    return int(min(cap, n8))                    # small graphs: one block, never split tiny


# ----------------------------------------------------------------------------
# Kernel 1: fused GNN state update.
#   grid = (node_blocks [parallel], num_rounds [arbitrary])
#   hs / hf are revisited output blocks (resident in VMEM across rounds).
#   Per grid step: one fused 3-layer MLP + one fused GRU cell covering all four
#   (and/not x strc/func) units; the int32 selector picks which result a node keeps.
# ----------------------------------------------------------------------------
def _gnn_kernel(sel_ref, x_ref, w_ref, b_ref, hs_ref, hf_ref, *, D, wl, bl):
    @pl.when(pl.program_id(1) == 0)
    def _init():                                   # hs = hf = ones at round 0
        hs_ref[...] = jnp.ones(hs_ref.shape, hs_ref.dtype)
        hf_ref[...] = jnp.ones(hf_ref.shape, hf_ref.dtype)

    def W(name):                                   # bf16 weight piece
        off, r, c = wl[name]
        return w_ref[off:off + r, 0:c]

    def B(name):                                   # f32 bias row
        off, r, c = bl[name]
        return b_ref[off:off + r, 0:c]

    def dot(a, b):                                 # bf16 x bf16 -> f32 accumulate
        return jnp.dot(a.astype(jnp.bfloat16), b, preferred_element_type=jnp.float32)

    x = x_ref[...]                                 # (bn, D)  f32
    hs = hs_ref[...]                               # (bn, D)
    hf = hf_ref[...]                               # (bn, D)
    sel = sel_ref[...]                             # (bn, 1)  int32

    D4 = 4 * D
    # fused 3-layer MLP aggregator (dropout = identity in eval mode)
    xin = jnp.concatenate([x, hf], axis=-1)                      # (bn, 2D)
    a = jnp.maximum(dot(xin, W('w1')) + B('b1'), 0.0)            # (bn, 4M)
    a = jnp.maximum(dot(a, W('w2')) + B('b2'), 0.0)              # (bn, 4M)
    msg = dot(a, W('w3')) + B('b3')                              # (bn, 4D)

    # fused single-step GRU cell (PyTorch gate ordering r, z, n)
    h_cat = jnp.concatenate([hs, hs, hf, hf], axis=-1)           # (bn, 4D)
    gi = dot(msg, W('wih'))                                      # (bn, 12D)
    gh = dot(h_cat, W('whh'))                                    # (bn, 12D)
    r = jax.nn.sigmoid(gi[:, 0:D4] + gh[:, 0:D4] + B('br'))
    z = jax.nn.sigmoid(gi[:, D4:2 * D4] + gh[:, D4:2 * D4] + B('bz'))
    n = jnp.tanh(gi[:, 2 * D4:3 * D4] + B('bin') + r * (gh[:, 2 * D4:3 * D4] + B('bhn')))
    h_new = (1.0 - z) * n + z * h_cat                            # (bn, 4D)

    m_and = sel == 1
    m_not = sel == 2
    hs_ref[...] = jnp.where(m_and, h_new[:, 0:D],
                            jnp.where(m_not, h_new[:, D:2 * D], hs))
    hf_ref[...] = jnp.where(m_and, h_new[:, 2 * D:3 * D],
                            jnp.where(m_not, h_new[:, 3 * D:4 * D], hf))


def gnn_update(x, sel, w_slab, w_layout, b_slab, b_layout, *, num_rounds, D, M):
    """Run the full (rounds x {and,not} x {strc,func}) update in ONE pallas_call."""
    N, Din = x.shape
    # rough per-row VMEM working set (f32): x, hs/hf, two 4M activations,
    # msg + h_cat + h_new (3 x 4D) and the two 12D gate pre-activations.
    row_bytes = 4 * (Din + 2 * D + 2 * (4 * M) + 3 * (4 * D) + 2 * (12 * D))
    block_n = _choose_block_rows(N, row_bytes)
    Np = -(-N // block_n) * block_n
    if Np != N:                                    # pad to whole row blocks (sel=0 there)
        x = jnp.zeros((Np, Din), jnp.float32).at[:N].set(x)
        sel = jnp.zeros((Np, 1), jnp.int32).at[:N].set(sel)
    nb = Np // block_n

    steps = nb * num_rounds
    flops_row = 2 * (2 * D * 4 * M + (4 * M) ** 2 + 4 * M * 4 * D + 2 * (4 * D) * (12 * D))
    cost = pl.CostEstimate(
        flops=int(steps * block_n * flops_row),
        transcendentals=int(steps * 12 * block_n * D),
        bytes_accessed=int(w_slab.size * 2 + b_slab.size * 4
                           + Np * (Din + 1 + 2 * D) * 4))

    kernel = functools.partial(_gnn_kernel, D=D, wl=w_layout, bl=b_layout)
    hs, hf = pl.pallas_call(
        kernel,
        out_shape=(jax.ShapeDtypeStruct((Np, D), jnp.float32),
                   jax.ShapeDtypeStruct((Np, D), jnp.float32)),
        grid=(nb, num_rounds),                               # rounds = inner, revisit axis
        in_specs=[pl.BlockSpec((block_n, 1), lambda n, r: (n, 0)),      # int32 selector
                  pl.BlockSpec((block_n, Din), lambda n, r: (n, 0)),    # node features
                  pl.BlockSpec(w_slab.shape, lambda n, r: (0, 0)),      # bf16 weights (one DMA)
                  pl.BlockSpec(b_slab.shape, lambda n, r: (0, 0))],     # f32 biases
        out_specs=(pl.BlockSpec((block_n, D), lambda n, r: (n, 0)),     # hs (resident)
                   pl.BlockSpec((block_n, D), lambda n, r: (n, 0))),    # hf (resident)
        compiler_params=pltpu.CompilerParams(
            dimension_semantics=("parallel", "arbitrary")),
        cost_estimate=cost,
    )(sel, x, w_slab, b_slab)
    return hs[:N], hf[:N]


# ----------------------------------------------------------------------------
# Kernel 2: readout MLP  (Linear+BN(eval) folded -> ReLU) x 2 -> Linear [-> sigmoid]
# Output padded to 128 lanes (unmasked stores); real column sliced outside.
# ----------------------------------------------------------------------------
def _readout_kernel(x_ref, w_ref, out_ref, *, layout, use_sigmoid):
    def W(name):
        off, r, c = layout[name]
        return w_ref[off:off + r, 0:c]

    def dot(a, b):
        return jnp.dot(a, b, preferred_element_type=jnp.float32)

    x = x_ref[...]
    a = jnp.maximum(dot(x, W('w1')) + W('b1'), 0.0)
    a = jnp.maximum(dot(a, W('w2')) + W('b2'), 0.0)
    y = dot(a, W('w3')) + W('b3')
    if use_sigmoid:
        y = jax.nn.sigmoid(y)
    out_ref[...] = y


def readout_mlp(x, w_slab, layout, dout, *, use_sigmoid):
    N, Din = x.shape
    M = layout['w2'][2]
    pad_out = layout['w3'][2]
    row_bytes = 4 * (Din + 2 * M + pad_out)
    block_n = _choose_block_rows(N, row_bytes)
    Np = -(-N // block_n) * block_n
    if Np != N:
        x = jnp.zeros((Np, Din), jnp.float32).at[:N].set(x)

    cost = pl.CostEstimate(
        flops=int(2 * Np * (Din * M + M * M + M * pad_out)),
        transcendentals=int(Np * pad_out if use_sigmoid else 0),
        bytes_accessed=int(w_slab.size * 4 + Np * (Din + pad_out) * 4))

    kernel = functools.partial(_readout_kernel, layout=layout, use_sigmoid=use_sigmoid)
    y = pl.pallas_call(
        kernel,
        out_shape=jax.ShapeDtypeStruct((Np, pad_out), jnp.float32),
        grid=(Np // block_n,),
        in_specs=[pl.BlockSpec((block_n, Din), lambda i: (i, 0)),
                  pl.BlockSpec(w_slab.shape, lambda i: (0, 0))],
        out_specs=pl.BlockSpec((block_n, pad_out), lambda i: (i, 0)),
        compiler_params=pltpu.CompilerParams(dimension_semantics=("parallel",)),
        cost_estimate=cost,
    )(x, w_slab)
    return y[:N, :dout]


# ----------------------------------------------------------------------------
# Deterministic parameter initialization (shapes match the nn.Module __init__)
# ----------------------------------------------------------------------------
def init_linear(key, din, dout):
    k1, k2 = jax.random.split(key)
    bound = 1.0 / np.sqrt(din)
    w = jax.random.uniform(k1, (din, dout), jnp.float32, -bound, bound)
    b = jax.random.uniform(k2, (1, dout), jnp.float32, -bound, bound)
    return w, b


def init_mlp3(key, din, dmlp, dout):
    k1, k2, k3 = jax.random.split(key, 3)
    w1, b1 = init_linear(k1, din, dmlp)
    w2, b2 = init_linear(k2, dmlp, dmlp)
    w3, b3 = init_linear(k3, dmlp, dout)
    return (w1, b1, w2, b2, w3, b3)


def init_gru(key, din, dh):
    k1, k2, k3, k4 = jax.random.split(key, 4)
    bound = 1.0 / np.sqrt(dh)
    wih = jax.random.uniform(k1, (din, 3 * dh), jnp.float32, -bound, bound)
    whh = jax.random.uniform(k2, (dh, 3 * dh), jnp.float32, -bound, bound)
    bih = jax.random.uniform(k3, (1, 3 * dh), jnp.float32, -bound, bound)
    bhh = jax.random.uniform(k4, (1, 3 * dh), jnp.float32, -bound, bound)
    return (wih, whh, bih, bhh)


def init_readout(key, din, dmlp, dout):
    w1, b1, w2, b2, w3, b3 = init_mlp3(key, din, dmlp, dout)
    # Fresh BatchNorm1d in eval mode: gamma=1, beta=0, mean=0, var=1.
    eps = 1e-5
    scale = jnp.full((1, dmlp), 1.0 / np.sqrt(1.0 + eps), jnp.float32)
    shift = jnp.zeros((1, dmlp), jnp.float32)
    return (w1, b1, scale, shift, w2, b2, scale, shift, w3, b3)


# ----------------------------------------------------------------------------
# MLPGateDGL forward (thin JAX glue around the two Pallas kernels)
# ----------------------------------------------------------------------------
def mlpgate_forward(params, x, forward_level_np, gate, rc_pair_index,
                    *, num_rounds, dim_hidden, dim_mlp):
    N = x.shape[0]
    D, M = dim_hidden, dim_mlp
    assert x.shape[1] == D, "aggr_*_strc consumes x directly -> dim_node_feature == dim_hidden"
    num_layers_f = int(np.asarray(forward_level_np).max()) + 1

    if num_layers_f > 1 and num_rounds > 0:
        w_slab, wl, b_slab, bl = pack_gnn_weights(params, D, M)
        # Per-node selector (levels collapse: within a round every node updates
        # at most once using its own start-of-round state):
        #   0 = no update, 1 = AND update, 2 = NOT update
        fl = jnp.asarray(np.asarray(forward_level_np), jnp.int32)
        gi = gate.astype(jnp.int32)
        sel = jnp.where((fl >= 1) & ((gi == 1) | (gi == 2)), gi, 0).astype(jnp.int32)[:, None]
        hs, hf = gnn_update(x.astype(jnp.float32), sel, w_slab, wl, b_slab, bl,
                            num_rounds=num_rounds, D=D, M=M)
    else:
        hs = jnp.ones((N, D), jnp.float32)
        hf = jnp.ones((N, D), jnp.float32)

    prob_slab, prob_layout, prob_dout = pack_readout_weights(params['readout_prob'])
    rc_slab, rc_layout, rc_dout = pack_readout_weights(params['readout_rc'])
    prob = readout_mlp(hf, prob_slab, prob_layout, prob_dout, use_sigmoid=False)
    rc_emb = jnp.concatenate([hs[rc_pair_index[0]], hs[rc_pair_index[1]]], axis=1)
    is_rc = readout_mlp(rc_emb, rc_slab, rc_layout, rc_dout, use_sigmoid=True)
    return hs, hf, prob, is_rc


if __name__ == "__main__":
    # args mirror: dim_node_feature must equal dim_hidden (aggr_*_strc consumes x directly)
    args = dict(dim_node_feature=32, dim_hidden=32, dim_mlp=32, num_rounds=2)
    D, M = args['dim_hidden'], args['dim_mlp']
    N = 64            # number of graph nodes
    P = 8             # number of rc pairs

    key = jax.random.PRNGKey(0)
    ks = jax.random.split(key, 16)

    # synthetic "DGL graph" node data
    forward_level_np = np.zeros(N, np.int32)
    forward_level_np[16:40] = 1
    forward_level_np[40:64] = 2
    gate_np = np.zeros(N, np.int32)
    gate_np[16:40] = np.where(np.arange(24) % 2 == 0, 1, 2)   # AND / NOT gates
    gate_np[40:64] = np.where(np.arange(24) % 3 == 0, 2, 1)
    gate = jnp.asarray(gate_np)

    x = jax.random.normal(ks[0], (N, args['dim_node_feature']), jnp.float32)
    rc_pair_index = jax.random.randint(ks[1], (2, P), 0, N)

    # parameters (deterministic, shapes per __init__)
    params = {
        'aggr_and_strc': init_mlp3(ks[2], D, M, D),
        'aggr_and_func': init_mlp3(ks[3], 2 * D, M, D),
        'aggr_not_strc': init_mlp3(ks[4], D, M, D),
        'aggr_not_func': init_mlp3(ks[5], 2 * D, M, D),
        'update_and_strc': init_gru(ks[6], D, D),
        'update_and_func': init_gru(ks[7], D, D),
        'update_not_strc': init_gru(ks[8], D, D),
        'update_not_func': init_gru(ks[9], D, D),
        'readout_prob': init_readout(ks[10], D, M, 1),
        'readout_rc': init_readout(ks[11], 2 * D, M, 1),
        # TODO(synk): self.hf_emd_int = nn.Linear(1, dim_hidden) is declared but
        # never used in forward(); omitted.
    }

    hs, hf, prob, is_rc = mlpgate_forward(
        params, x, forward_level_np, gate, rc_pair_index,
        num_rounds=args['num_rounds'], dim_hidden=D, dim_mlp=M)

    jax.block_until_ready((hs, hf, prob, is_rc))
    assert hs.shape == (N, D) and hf.shape == (N, D)
    assert prob.shape == (N, 1) and is_rc.shape == (P, 1)
    assert bool(jnp.all(jnp.isfinite(hs))) and bool(jnp.all(jnp.isfinite(hf)))
    assert bool(jnp.all(jnp.isfinite(prob))) and bool(jnp.all(jnp.isfinite(is_rc)))
    print("KERNEL_OK")
</pallas_src>

<mosaic_0001>
module attributes {stable_mosaic.version = 11 : i64} {
  func.func @_gnn_kernel(%arg0: i32, %arg1: i32, %arg2: memref<64x1xi32, #tpu.memory_space<vmem>>, %arg3: memref<64x32xf32, #tpu.memory_space<vmem>>, %arg4: memref<576x384xbf16, #tpu.memory_space<vmem>>, %arg5: memref<8x128xf32, #tpu.memory_space<vmem>>, %arg6: memref<64x32xf32, #tpu.memory_space<vmem>>, %arg7: memref<64x32xf32, #tpu.memory_space<vmem>>) attributes {dimension_semantics = [#tpu.dimension_semantics<parallel>, #tpu.dimension_semantics<arbitrary>], iteration_bounds = array<i64: 1, 2>, scalar_prefetch = 0 : i64, scratch_operands = 0 : i64, tpu.core_type = #tpu.core_type<tc>, window_params = [{transform_indices = @transform_0, window_bounds = array<i64: 64, 1>}, {transform_indices = @transform_1, window_bounds = array<i64: 64, 32>}, {pipeline_mode = #tpu.pipeline_mode<synchronous>, transform_indices = @transform_2, window_bounds = array<i64: 576, 384>}, {pipeline_mode = #tpu.pipeline_mode<synchronous>, transform_indices = @transform_3, window_bounds = array<i64: 8, 128>}, {transform_indices = @transform_4, window_bounds = array<i64: 64, 32>}, {transform_indices = @transform_5, window_bounds = array<i64: 64, 32>}]} {
    %c0_i32 = arith.constant 0 : i32
    %0 = arith.cmpi eq, %arg1, %c0_i32 : i32
    %1 = arith.extui %0 : i1 to i32
    %c0_i32_0 = arith.constant 0 : i32
    %2 = arith.cmpi ne, %1, %c0_i32_0 : i32
    scf.if %2 {
      %cst_35 = arith.constant 1.000000e+00 : f32
      %97 = vector.broadcast %cst_35 : f32 to vector<64x32xf32>
      %c0_36 = arith.constant 0 : index
      %c0_37 = arith.constant 0 : index
      %98 = vector.load %arg6[%c0_36, %c0_37] : memref<64x32xf32, #tpu.memory_space<vmem>>, vector<64x32xf32>
      tpu.vector_store %arg6[%c0_36, %c0_37], %97 {strides = array<i32>} : memref<64x32xf32, #tpu.memory_space<vmem>>, vector<64x32xf32>,
      %cst_38 = arith.constant 1.000000e+00 : f32
      %99 = vector.broadcast %cst_38 : f32 to vector<64x32xf32>
      %c0_39 = arith.constant 0 : index
      %c0_40 = arith.constant 0 : index
      %100 = vector.load %arg7[%c0_39, %c0_40] : memref<64x32xf32, #tpu.memory_space<vmem>>, vector<64x32xf32>
      tpu.vector_store %arg7[%c0_39, %c0_40], %99 {strides = array<i32>} : memref<64x32xf32, #tpu.memory_space<vmem>>, vector<64x32xf32>,
    } else {
    }
    %c0 = arith.constant 0 : index
    %c0_1 = arith.constant 0 : index
    %3 = vector.load %arg3[%c0, %c0_1] : memref<64x32xf32, #tpu.memory_space<vmem>>, vector<64x32xf32>
    %c0_2 = arith.constant 0 : index
    %c0_3 = arith.constant 0 : index
    %4 = vector.load %arg6[%c0_2, %c0_3] : memref<64x32xf32, #tpu.memory_space<vmem>>, vector<64x32xf32>
    %c0_4 = arith.constant 0 : index
    %c0_5 = arith.constant 0 : index
    %5 = vector.load %arg7[%c0_4, %c0_5] : memref<64x32xf32, #tpu.memory_space<vmem>>, vector<64x32xf32>
    %c0_6 = arith.constant 0 : index
    %c0_7 = arith.constant 0 : index
    %6 = vector.load %arg2[%c0_6, %c0_7] : memref<64x1xi32, #tpu.memory_space<vmem>>, vector<64x1xi32>
    %7 = tpu.concatenate %3, %5 in 1 : vector<64x32xf32>, vector<64x32xf32> -> vector<64x64xf32>
    %c0_8 = arith.constant 0 : index
    %c0_9 = arith.constant 0 : index
    %8 = vector.load %arg4[%c0_8, %c0_9] : memref<576x384xbf16, #tpu.memory_space<vmem>>, vector<64x128xbf16>
    %9 = arith.truncf %7 : vector<64x64xf32> to vector<64x64xbf16>
    %cst = arith.constant dense<0.000000e+00> : vector<64x128xf32>
    %10 = tpu.matmul %9, %8, %cst {dimension_numbers = #tpu.dot_dimension_numbers<[1], [0], [0], [1], [0, 0, 1, 1], [], []>} : vector<64x64xbf16>, vector<64x128xbf16>, vector<64x128xf32> -> vector<64x128xf32>
    %c0_10 = arith.constant 0 : index
    %c0_11 = arith.constant 0 : index
    %11 = vector.load %arg5[%c0_10, %c0_11] : memref<8x128xf32, #tpu.memory_space<vmem>>, vector<1x128xf32>
    %12 = vector.broadcast %11 : vector<1x128xf32> to vector<64x128xf32>
    %13 = arith.addf %10, %12 : vector<64x128xf32>
    %cst_12 = arith.constant 0.000000e+00 : f32
    %14 = vector.broadcast %cst_12 : f32 to vector<64x128xf32>
    %15 = arith.maximumf %13, %14 : vector<64x128xf32>
    %c64 = arith.constant 64 : index
    %c0_13 = arith.constant 0 : index
    %16 = vector.load %arg4[%c64, %c0_13] : memref<576x384xbf16, #tpu.memory_space<vmem>>, vector<128x128xbf16>
    %17 = arith.truncf %15 : vector<64x128xf32> to vector<64x128xbf16>
    %cst_14 = arith.constant dense<0.000000e+00> : vector<64x128xf32>
    %18 = tpu.matmul %17, %16, %cst_14 {dimension_numbers = #tpu.dot_dimension_numbers<[1], [0], [0], [1], [0, 0, 1, 1], [], []>} : vector<64x128xbf16>, vector<128x128xbf16>, vector<64x128xf32> -> vector<64x128xf32>
    %c1 = arith.constant 1 : index
    %c0_15 = arith.constant 0 : index
    %19 = vector.load %arg5[%c1, %c0_15] : memref<8x128xf32, #tpu.memory_space<vmem>>, vector<1x128xf32>
    %20 = vector.broadcast %19 : vector<1x128xf32> to vector<64x128xf32>
    %21 = arith.addf %18, %20 : vector<64x128xf32>
    %cst_16 = arith.constant 0.000000e+00 : f32
    %22 = vector.broadcast %cst_16 : f32 to vector<64x128xf32>
    %23 = arith.maximumf %21, %22 : vector<64x128xf32>
    %c192 = arith.constant 192 : index
    %c0_17 = arith.constant 0 : index
    %24 = vector.load %arg4[%c192, %c0_17] : memref<576x384xbf16, #tpu.memory_space<vmem>>, vector<128x128xbf16>
    %25 = arith.truncf %23 : vector<64x128xf32> to vector<64x128xbf16>
    %cst_18 = arith.constant dense<0.000000e+00> : vector<64x128xf32>
    %26 = tpu.matmul %25, %24, %cst_18 {dimension_numbers = #tpu.dot_dimension_numbers<[1], [0], [0], [1], [0, 0, 1, 1], [], []>} : vector<64x128xbf16>, vector<128x128xbf16>, vector<64x128xf32> -> vector<64x128xf32>
    %c2 = arith.constant 2 : index
    %c0_19 = arith.constant 0 : index
    %27 = vector.load %arg5[%c2, %c0_19] : memref<8x128xf32, #tpu.memory_space<vmem>>, vector<1x128xf32>
    %28 = vector.broadcast %27 : vector<1x128xf32> to vector<64x128xf32>
    %29 = arith.addf %26, %28 : vector<64x128xf32>
    %30 = tpu.concatenate %4, %4, %5, %5 in 1 : vector<64x32xf32>, vector<64x32xf32>, vector<64x32xf32>, vector<64x32xf32> -> vector<64x128xf32>
    %c320 = arith.constant 320 : index
    %c0_20 = arith.constant 0 : index
    %31 = vector.load %arg4[%c320, %c0_20] : memref<576x384xbf16, #tpu.memory_space<vmem>>, vector<128x384xbf16>
    %32 = arith.truncf %29 : vector<64x128xf32> to vector<64x128xbf16>
    %cst_21 = arith.constant dense<0.000000e+00> : vector<64x384xf32>
    %33 = tpu.matmul %32, %31, %cst_21 {dimension_numbers = #tpu.dot_dimension_numbers<[1], [0], [0], [1], [0, 0, 1, 1], [], []>} : vector<64x128xbf16>, vector<128x384xbf16>, vector<64x384xf32> -> vector<64x384xf32>
    %c448 = arith.constant 448 : index
    %c0_22 = arith.constant 0 : index
    %34 = vector.load %arg4[%c448, %c0_22] : memref<576x384xbf16, #tpu.memory_space<vmem>>, vector<128x384xbf16>
    %35 = arith.truncf %30 : vector<64x128xf32> to vector<64x128xbf16>
    %cst_23 = arith.constant dense<0.000000e+00> : vector<64x384xf32>
    %36 = tpu.matmul %35, %34, %cst_23 {dimension_numbers = #tpu.dot_dimension_numbers<[1], [0], [0], [1], [0, 0, 1, 1], [], []>} : vector<64x128xbf16>, vector<128x384xbf16>, vector<64x384xf32> -> vector<64x384xf32>
    %37 = vector.extract_strided_slice %33 {offsets = [0, 0], sizes = [64, 128], strides = [1, 1]} : vector<64x384xf32> to vector<64x128xf32>
    %38 = vector.extract_strided_slice %36 {offsets = [0, 0], sizes = [64, 128], strides = [1, 1]} : vector<64x384xf32> to vector<64x128xf32>
    %39 = arith.addf %37, %38 : vector<64x128xf32>
    %c3 = arith.constant 3 : index
    %c0_24 = arith.constant 0 : index
    %40 = vector.load %arg5[%c3, %c0_24] : memref<8x128xf32, #tpu.memory_space<vmem>>, vector<1x128xf32>
    %41 = vector.broadcast %40 : vector<1x128xf32> to vector<64x128xf32>
    %42 = arith.addf %39, %41 : vector<64x128xf32>
    %43 = arith.negf %42 : vector<64x128xf32>
    %44 = math.exp %43 : vector<64x128xf32>
    %cst_25 = arith.constant 1.000000e+00 : f32
    %45 = vector.broadcast %cst_25 : f32 to vector<64x128xf32>
    %46 = arith.addf %45, %44 : vector<64x128xf32>
    %47 = arith.divf %45, %46 : vector<64x128xf32>
    %48 = vector.extract_strided_slice %33 {offsets = [0, 128], sizes = [64, 128], strides = [1, 1]} : vector<64x384xf32> to vector<64x128xf32>
    %49 = vector.extract_strided_slice %36 {offsets = [0, 128], sizes = [64, 128], strides = [1, 1]} : vector<64x384xf32> to vector<64x128xf32>
    %50 = arith.addf %48, %49 : vector<64x128xf32>
    %c4 = arith.constant 4 : index
    %c0_26 = arith.constant 0 : index
    %51 = vector.load %arg5[%c4, %c0_26] : memref<8x128xf32, #tpu.memory_space<vmem>>, vector<1x128xf32>
    %52 = vector.broadcast %51 : vector<1x128xf32> to vector<64x128xf32>
    %53 = arith.addf %50, %52 : vector<64x128xf32>
    %54 = arith.negf %53 : vector<64x128xf32>
    %55 = math.exp %54 : vector<64x128xf32>
    %cst_27 = arith.constant 1.000000e+00 : f32
    %56 = vector.broadcast %cst_27 : f32 to vector<64x128xf32>
    %57 = arith.addf %56, %55 : vector<64x128xf32>
    %58 = arith.divf %56, %57 : vector<64x128xf32>
    %59 = vector.extract_strided_slice %33 {offsets = [0, 256], sizes = [64, 128], strides = [1, 1]} : vector<64x384xf32> to vector<64x128xf32>
    %c5 = arith.constant 5 : index
    %c0_28 = arith.constant 0 : index
    %60 = vector.load %arg5[%c5, %c0_28] : memref<8x128xf32, #tpu.memory_space<vmem>>, vector<1x128xf32>
    %61 = vector.broadcast %60 : vector<1x128xf32> to vector<64x128xf32>
    %62 = arith.addf %59, %61 : vector<64x128xf32>
    %63 = vector.extract_strided_slice %36 {offsets = [0, 256], sizes = [64, 128], strides = [1, 1]} : vector<64x384xf32> to vector<64x128xf32>
    %c6 = arith.constant 6 : index
    %c0_29 = arith.constant 0 : index
    %64 = vector.load %arg5[%c6, %c0_29] : memref<8x128xf32, #tpu.memory_space<vmem>>, vector<1x128xf32>
    %65 = vector.broadcast %64 : vector<1x128xf32> to vector<64x128xf32>
    %66 = arith.addf %63, %65 : vector<64x128xf32>
    %67 = arith.mulf %47, %66 : vector<64x128xf32>
    %68 = arith.addf %62, %67 : vector<64x128xf32>
    %69 = math.tanh %68 : vector<64x128xf32>
    %cst_30 = arith.constant 1.000000e+00 : f32
    %70 = vector.broadcast %cst_30 : f32 to vector<64x128xf32>
    %71 = arith.subf %70, %58 : vector<64x128xf32>
    %72 = arith.mulf %71, %69 : vector<64x128xf32>
    %73 = arith.mulf %58, %30 : vector<64x128xf32>
    %74 = arith.addf %72, %73 : vector<64x128xf32>
    %c1_i32 = arith.constant 1 : i32
    %75 = vector.broadcast %c1_i32 : i32 to vector<64x1xi32>
    %76 = arith.cmpi eq, %6, %75 : vector<64x1xi32>
    %c2_i32 = arith.constant 2 : i32
    %77 = vector.broadcast %c2_i32 : i32 to vector<64x1xi32>
    %78 = arith.cmpi eq, %6, %77 : vector<64x1xi32>
    %79 = vector.extract_strided_slice %74 {offsets = [0, 0], sizes = [64, 32], strides = [1, 1]} : vector<64x128xf32> to vector<64x32xf32>
    %80 = vector.extract_strided_slice %74 {offsets = [0, 32], sizes = [64, 32], strides = [1, 1]} : vector<64x128xf32> to vector<64x32xf32>
    %81 = vector.shape_cast %78 : vector<64x1xi1> to vector<64x1xi1>
    %82 = vector.broadcast %81 : vector<64x1xi1> to vector<64x32xi1>
    %83 = arith.select %82, %80, %4 : vector<64x32xi1>, vector<64x32xf32>
    %84 = vector.shape_cast %76 : vector<64x1xi1> to vector<64x1xi1>
    %85 = vector.broadcast %84 : vector<64x1xi1> to vector<64x32xi1>
    %86 = arith.select %85, %79, %83 : vector<64x32xi1>, vector<64x32xf32>
    %c0_31 = arith.constant 0 : index
    %c0_32 = arith.constant 0 : index
    %87 = vector.load %arg6[%c0_31, %c0_32] : memref<64x32xf32, #tpu.memory_space<vmem>>, vector<64x32xf32>
    tpu.vector_store %arg6[%c0_31, %c0_32], %86 {strides = array<i32>} : memref<64x32xf32, #tpu.memory_space<vmem>>, vector<64x32xf32>,
    %88 = vector.extract_strided_slice %74 {offsets = [0, 64], sizes = [64, 32], strides = [1, 1]} : vector<64x128xf32> to vector<64x32xf32>
    %89 = vector.extract_strided_slice %74 {offsets = [0, 96], sizes = [64, 32], strides = [1, 1]} : vector<64x128xf32> to vector<64x32xf32>
    %90 = vector.shape_cast %78 : vector<64x1xi1> to vector<64x1xi1>
    %91 = vector.broadcast %90 : vector<64x1xi1> to vector<64x32xi1>
    %92 = arith.select %91, %89, %5 : vector<64x32xi1>, vector<64x32xf32>
    %93 = vector.shape_cast %76 : vector<64x1xi1> to vector<64x1xi1>
    %94 = vector.broadcast %93 : vector<64x1xi1> to vector<64x32xi1>
    %95 = arith.select %94, %88, %92 : vector<64x32xi1>, vector<64x32xf32>
    %c0_33 = arith.constant 0 : index
    %c0_34 = arith.constant 0 : index
    %96 = vector.load %arg7[%c0_33, %c0_34] : memref<64x32xf32, #tpu.memory_space<vmem>>, vector<64x32xf32>
    tpu.vector_store %arg7[%c0_33, %c0_34], %95 {strides = array<i32>} : memref<64x32xf32, #tpu.memory_space<vmem>>, vector<64x32xf32>,
    return
  }
  func.func @transform_0(%arg0: i32, %arg1: i32) -> (i32, i32) {
    %c0_i32 = arith.constant 0 : i32
    %c0_i32_0 = arith.constant 0 : i32
    return %arg0, %c0_i32 : i32, i32
  }
  func.func @transform_1(%arg0: i32, %arg1: i32) -> (i32, i32) {
    %c0_i32 = arith.constant 0 : i32
    %c0_i32_0 = arith.constant 0 : i32
    return %arg0, %c0_i32 : i32, i32
  }
  func.func @transform_2(%arg0: i32, %arg1: i32) -> (i32, i32) {
    %c0_i32 = arith.constant 0 : i32
    %c0_i32_0 = arith.constant 0 : i32
    %c0_i32_1 = arith.constant 0 : i32
    return %c0_i32, %c0_i32_0 : i32, i32
  }
  func.func @transform_3(%arg0: i32, %arg1: i32) -> (i32, i32) {
    %c0_i32 = arith.constant 0 : i32
    %c0_i32_0 = arith.constant 0 : i32
    %c0_i32_1 = arith.constant 0 : i32
    return %c0_i32, %c0_i32_0 : i32, i32
  }
  func.func @transform_4(%arg0: i32, %arg1: i32) -> (i32, i32) {
    %c0_i32 = arith.constant 0 : i32
    %c0_i32_0 = arith.constant 0 : i32
    return %arg0, %c0_i32 : i32, i32
  }
  func.func @transform_5(%arg0: i32, %arg1: i32) -> (i32, i32) {
    %c0_i32 = arith.constant 0 : i32
    %c0_i32_0 = arith.constant 0 : i32
    return %arg0, %c0_i32 : i32, i32
  }
}

</mosaic_0001>

<bundles_post_ra>
// kernel: tpu_custom_call.1
= control target key start
LH: loop header
LB: loop body
LE: loop exit
PB: predicated region body
PF: predicated region fallthrough
CT: control target
= control target key end

     0   :  { %11 = vsyncpa [#allocation3], 0  ;;  %s2686_s18 = smov 0   ;;  %s2688_s19 = smov 0   ;;  %s3469_s0 = inlined_call_operand.vmem [shape: s32[64,1], index: 0, kind: input, shape index: {}]   ;;  %s3470_s1 = inlined_call_operand.vmem [shape: f32[64,32], index: 1, kind: input, shape index: {}]   ;;  %s3471_s2 = inlined_call_operand.hbm [shape: bf16[576,384], index: 2, kind: input, shape index: {}]   ;;  %s3472_s3 = inlined_call_operand.vmem [shape: f32[8,128], index: 3, kind: input, shape index: {}]   ;;  %s3473_s4 = inlined_call_operand.vmem [shape: f32[64,32], index: 4, kind: output, shape index: {0}]   ;;  %s3474_s5 = inlined_call_operand.vmem [shape: f32[64,32], index: 5, kind: output, shape index: {1}]  }
   0x1   :  { %s2690_s20 = smov 0  }
   0x2 LB: > { %s2089_s21 = sadd.s32 4294967295, %s2646_s20   ;;  %s26_s22 = sadd.s32 1, %s2642_s19  ;;  %s2646_s20 = sphi %s2690_s20, %s17_s20   ;;  %s2642_s19 = sphi %s2688_s19, %s3478_s19   ;;  %s2638_s18 = sphi %s2686_s18, %s3477_s18  }
   0x3   : > { %p27_p0 = scmp.ge.s32.totalorder %s26_s22, 2  ;;  %p2090_p1 = scmp.ge.s32.totalorder %s2646_s20, 1 }
   0x4   : > { %p180_p2 = scmp.lt.s32.totalorder %s2646_s20, 3  ;;  %p2711_p4 = scmp.eq.s32.totalorder %s2089_s21, 0 }
   0x5   : > { %s3480_s22 = smov (%p27_p0, %s26_s22), 0  ;;  %s2648_s25 = smov [#allocation2]  }
   0x6   : > { %p2707_p3 = pnand %p2090_p1, %p180_p2  ;;  %s210_s26 = sshll.u32 %s2648_s25, 4  ;;  %s211_s26 = int_to_ptr.vmem [resolvable:$true] %s210_s26 }
   0x7   : > { %s2605_s27 = scalar_lea.vmem %s211_s26, 13824  ;;  %p2613_p11 = scmp.lt.s32.totalorder %s211_s26, %s211_s26 }
   0x8   : > { %p2370_p5 = pneg %p2707_p3  ;;  %p2606_p8 = scmp.ne.s32.totalorder %s211_s26, %s2605_s27 }
   0x9   : > { %p2614_p12 = scmp.lt.s32.totalorder %s2605_s27, %s2605_s27 }
   0xa   : > { %p2371_p6 = pnand %p2711_p4, %p2370_p5 }
   0xb   : > { %p2615_p13 = por %p2614_p12, %p2613_p11 }
   0xc   : > { %p2596_p7 = pneg %p2371_p6 }
   0xe   : > { %p2608_p9 = pnand %p2606_p8, %p2596_p7 }
  0x10   : > { %p2609_p10 = pneg %p2608_p9 }
  0x12   : > { %p2616_p0 = pnand %p2615_p13, %p2609_p10 }
  0x14   : > { %2619 = shalt.err (!%p2616_p0)
}
  0x15   : > { %s2649_s28 = smov 192   ;;  %s2650_s29 = smov 12  }
  0x16   : > { %2373 = dma.hbm_to_vmem [thread:$0]  (!%p2371_p6), %s3471_s2, 13824, %s211_s26, [#allocation3], %s2649_s28, %s2649_s28, %s2650_s29  }
  0x17   : > { %229 = sbr.rel (%p2707_p3) target bundleno = 1335 (0x537), region = 36 }
  0x1c   : > { %2633 = dma.done.wait (%p2711_p4), [#allocation3], 13824  }
  0x1d   : > { %2635 = vsyncadd (%p2711_p4), [#allocation3], 4294953472  ;;  %p2096_p1 = scmp.ne.s32.totalorder %s2638_s18, 0 }
  0x1f   : > { %295 = sbr.rel (%p2096_p1) target bundleno = 45 (0x2d), region = 44 }
  0x24   : > { %vm296_vm0 = vcmask 261120   ;;  %v2651_v0 = vmov 1.0  }
  0x25   : > { %297 = vst.msk [vmem:[%s3473_s4] sm:$0xff] %vm296_vm0, %v2651_v0  ;;  %298 = vst.msk [vmem:[%s3473_s4 + $0x8] sm:$0xff] %vm296_vm0, %v2651_v0 }
  0x26   : > { %299 = vst.msk [vmem:[%s3473_s4 + $0x10] sm:$0xff] %vm296_vm0, %v2651_v0  ;;  %300 = vst.msk [vmem:[%s3473_s4 + $0x18] sm:$0xff] %vm296_vm0, %v2651_v0 }
  0x27   : > { %301 = vst.msk [vmem:[%s3473_s4 + $0x20] sm:$0xff] %vm296_vm0, %v2651_v0  ;;  %302 = vst.msk [vmem:[%s3473_s4 + $0x28] sm:$0xff] %vm296_vm0, %v2651_v0 }
  0x28   : > { %303 = vst.msk [vmem:[%s3473_s4 + $0x30] sm:$0xff] %vm296_vm0, %v2651_v0  ;;  %304 = vst.msk [vmem:[%s3473_s4 + $0x38] sm:$0xff] %vm296_vm0, %v2651_v0 }
  0x29   : > { %305 = vst.msk [vmem:[%s3474_s5] sm:$0xff] %vm296_vm0, %v2651_v0  ;;  %306 = vst.msk [vmem:[%s3474_s5 + $0x8] sm:$0xff] %vm296_vm0, %v2651_v0 }
  0x2a   : > { %307 = vst.msk [vmem:[%s3474_s5 + $0x10] sm:$0xff] %vm296_vm0, %v2651_v0  ;;  %308 = vst.msk [vmem:[%s3474_s5 + $0x18] sm:$0xff] %vm296_vm0, %v2651_v0 }
  0x2b   : > { %309 = vst.msk [vmem:[%s3474_s5 + $0x20] sm:$0xff] %vm296_vm0, %v2651_v0  ;;  %310 = vst.msk [vmem:[%s3474_s5 + $0x28] sm:$0xff] %vm296_vm0, %v2651_v0 }
  0x2c   : > { %311 = vst.msk [vmem:[%s3474_s5 + $0x30] sm:$0xff] %vm296_vm0, %v2651_v0  ;;  %312 = vst.msk [vmem:[%s3474_s5 + $0x38] sm:$0xff] %vm296_vm0, %v2651_v0 }
  0x2d PF: > { %s2652_s11 = smov 32   ;;  %v2430_v12 = vld [vmem:[#allocation2 + $0x48] ss:$12 sps:$4 sm:$0xff]   ;;  %v2431_v14 = vld [vmem:[#allocation2 + $0x30] ss:$12 sps:$4 sm:$0xff]   ;;  %vm377_vm1 = vcmask 261120  }
  0x2e   : > { %2254 = vmatprep.subr.bf16.mxu0 %v2430_v12  ;;  %v2432_v15 = vld [vmem:[#allocation2 + $0x18] ss:$12 sps:$4 sm:$0xff]   ;;  %v2433_v16 = vld [vmem:[#allocation2] ss:$12 sps:$4 sm:$0xff]   ;;  %v2434_v17 = vld [vmem:[#allocation2 + $0x108] ss:$12 sps:$4 sm:$0xff]  }
  0x2f   : > { %2255 = vmatpush3.bf16.msra.mxu0 %v2430_v12  ;;  %v2435_v18 = vld [vmem:[#allocation2 + $0xf0] ss:$12 sps:$4 sm:$0xff]   ;;  %2270 = vmatprep.subr.bf16.mxu1 %v2434_v17  ;;  %v2436_v19 = vld [vmem:[#allocation2 + $0xd8] ss:$12 sps:$4 sm:$0xff]   ;;  %v2437_v20 = vld [vmem:[#allocation2 + $0xc0] ss:$12 sps:$4 sm:$0xff]  }
  0x30   : > { %v2796_v1 = vld [vmem:[%s3474_s5] sm:$0xff]  ;;  %v2801_v2 = vld [vmem:[%s3474_s5 + $0x8] sm:$0xff]  ;;  %2256 = vmatprep.subr.bf16.mxu0 %v2431_v14  ;;  %2271 = vmatpush3.bf16.msra.mxu1 %v2434_v17  ;;  %vm427_vm2 = vcmask 523264   ;;  %v315_v35 = vld [vmem:[%s3470_s1 + $0x10] sm:$0xff]  ;;  %s2653_s13 = smov 64   ;;  %s2654_s14 = smov 96  }
  0x31   : > { %v2806_v3 = vld [vmem:[%s3474_s5 + $0x10] sm:$0xff]  ;;  %v2408_v4 = vpack.i.bf16 %v2801_v2, %v2796_v1  ;;  %v2813_v5 = vld [vmem:[%s3474_s5 + $0x18] sm:$0xff]  ;;  %2272 = vmatprep.subr.bf16.mxu1 %v2435_v18  ;;  %v313_v23 = vld [vmem:[%s3470_s1] sm:$0xff] }
  0x32   : > { %v2818_v6 = vld [vmem:[%s3474_s5 + $0x20] sm:$0xff]  ;;  %v2823_v7 = vld [vmem:[%s3474_s5 + $0x28] sm:$0xff]  ;;  %v2413_v11 = vpack.i.bf16 %v2813_v5, %v2806_v3  ;;  %v316_v36 = vld [vmem:[%s3470_s1 + $0x18] sm:$0xff] }
  0x33   : > { %v2418_v8 = vpack.i.bf16 %v2823_v7, %v2818_v6  ;;  %v2830_v9 = vld [vmem:[%s3474_s5 + $0x30] sm:$0xff]  ;;  %v2835_v10 = vld [vmem:[%s3474_s5 + $0x38] sm:$0xff]  ;;  %2409 = vrot.lane.b32.xlu0 %v2408_v4, %s2652_s11  ;;  %2257 = vmatpush3.bf16.msra.mxu0 %v2431_v14  ;;  %v314_v24 = vld [vmem:[%s3470_s1 + $0x8] sm:$0xff] }
  0x34   : > { %v2423_v13 = vpack.i.bf16 %v2835_v10, %v2830_v9  ;;  %2258 = vmatprep.subr.bf16.mxu0 %v2432_v15  ;;  %2273 = vmatpush3.bf16.msra.mxu1 %v2435_v18  ;;  %v2438_v21 = vld [vmem:[#allocation2 + $0xa8] ss:$12 sps:$4 sm:$0xff]   ;;  %v317_v28 = vld [vmem:[%s3470_s1 + $0x20] sm:$0xff]  ;;  %v320_v50 = vld [vmem:[%s3470_s1 + $0x38] sm:$0xff] }
  0x35   : > { %2419 = vrot.lane.b32.xlu1 %v2418_v8, %s2652_s11  ;;  %2274 = vmatprep.subr.bf16.mxu1 %v2436_v19  ;;  %v318_v29 = vld [vmem:[%s3470_s1 + $0x28] sm:$0xff]  ;;  %v319_v49 = vld [vmem:[%s3470_s1 + $0x30] sm:$0xff]  ;;  %v2440_v55 = vld [vmem:[#allocation2 + $0x78] ss:$12 sps:$4 sm:$0xff]  }
  0x36   : > { %v2439_v54 = vld [vmem:[#allocation2 + $0x90] ss:$12 sps:$4 sm:$0xff]   ;;  %v2441_v56 = vld [vmem:[#allocation2 + $0x60] ss:$12 sps:$4 sm:$0xff]   ;;  %v2442_v57 = vld [vmem:[#allocation2 + $0x1c8] ss:$12 sps:$4 sm:$0xff]  }
  0x37   : > { %2414 = vrot.lane.b32.xlu0 %v2413_v11, %s2652_s11  ;;  %2259 = vmatpush3.bf16.msra.mxu0 %v2432_v15  ;;  %v2443_v58 = vld [vmem:[#allocation2 + $0x1b0] ss:$12 sps:$4 sm:$0xff]   ;;  %v2444_v59 = vld [vmem:[#allocation2 + $0x198] ss:$12 sps:$4 sm:$0xff]   ;;  %v2445_v60 = vld [vmem:[#allocation2 + $0x180] ss:$12 sps:$4 sm:$0xff]  }
  0x38   : > { %2260 = vmatprep.subr.bf16.mxu0 %v2433_v16  ;;  %2275 = vmatpush3.bf16.msra.mxu1 %v2436_v19  ;;  %v2446_v61 = vld [vmem:[#allocation2 + $0x168] ss:$12 sps:$4 sm:$0xff]   ;;  %v2097_v0 = vld [vmem:[%s3472_s3] ss:$0 sm:$0xff] }
  0x39   : > { %2424 = vrot.lane.b32.xlu1 %v2423_v13, %s2652_s11  ;;  %2276 = vmatprep.subr.bf16.mxu1 %v2437_v20 }
  0x3b   : > { %2261 = vmatpush3.bf16.msra.mxu0 %v2433_v16 }
  0x3c   : > { %2277 = vmatpush3.bf16.msra.mxu1 %v2437_v20  ;;  %2294 = vmatprep.subr.bf16.mxu0 %v2442_v57 }
  0x3d   : > { %2278 = vmatprep.subr.bf16.mxu1 %v2438_v21 }
  0x40   : > { %2279 = vmatpush3.bf16.msra.mxu1 %v2438_v21 }
  0x41   : > { %2280 = vmatprep.subr.bf16.mxu1 %v2439_v54 }
  0x44   : > { %2281 = vmatpush3.bf16.msra.mxu1 %v2439_v54  ;;  %v2470_v54 = vld [vmem:[#allocation2 + $0x210] ss:$12 sps:$4 sm:$0xff]  }
  0x45   : > { %2282 = vmatprep.subr.bf16.mxu1 %v2440_v55 }
  0x48   : > { %2283 = vmatpush3.bf16.msra.mxu1 %v2440_v55  ;;  %v2106_v55 = vld [vmem:[%s3472_s3 + $0x1] ss:$0 sm:$0xff] }
  0x49   : > { %2284 = vmatprep.subr.bf16.mxu1 %v2441_v56 }
  0x4c   : > { %2285 = vmatpush3.bf16.msra.mxu1 %v2441_v56 }
  0xa5   : > { %v2410_v22 = vpop.permute.xlu0 %2409 }
  0xa6   : > { %v2412_v25 = vunpack.i.h.bf16 %v2410_v22  ;;  %v2411_v26 = vunpack.i.l.bf16 %v2410_v22 }
  0xa7   : > { %v2420_v27 = vpop.permute.xlu1 %2419 }
  0xa8   : > { %v2422_v30 = vunpack.i.h.bf16 %v2420_v27  ;;  %v2421_v31 = vunpack.i.l.bf16 %v2420_v27  ;;  %v378_v32 = vsel %vm377_vm1, %v313_v23, %v2411_v26  ;;  %v379_v33 = vsel %vm377_vm1, %v314_v24, %v2412_v25 }
  0xa9   : > { %v2415_v34 = vpop.permute.xlu0 %2414  ;;  %v394_v37 = vpack.c.bf16 %v379_v33, %v378_v32 }
  0xaa   : > { %v382_v38 = vsel %vm377_vm1, %v317_v28, %v2421_v31  ;;  %v383_v39 = vsel %vm377_vm1, %v318_v29, %v2422_v30  ;;  %v2417_v40 = vunpack.i.h.bf16 %v2415_v34  ;;  %v2416_v41 = vunpack.i.l.bf16 %v2415_v34 }
  0xab   : > { %v2425_v42 = vpop.permute.xlu1 %2424  ;;  %2262 = vmatprep.mubr.msk.bf16.mxu0 %vm427_vm2, %v394_v37  ;;  %v396_v43 = vpack.c.bf16 %v383_v39, %v382_v38  ;;  %v2449_v37 = vld [vmem:[#allocation2 + $0x120] ss:$12 sps:$4 sm:$0xff]  }
  0xac   : > { %v380_v44 = vsel %vm377_vm1, %v315_v35, %v2416_v41  ;;  %v381_v45 = vsel %vm377_vm1, %v316_v36, %v2417_v40  ;;  %v2427_v46 = vunpack.i.h.bf16 %v2425_v42  ;;  %v2426_v47 = vunpack.i.l.bf16 %v2425_v42  ;;  %v2447_v35 = vld [vmem:[#allocation2 + $0x150] ss:$12 sps:$4 sm:$0xff]   ;;  %v2448_v36 = vld [vmem:[#allocation2 + $0x138] ss:$12 sps:$4 sm:$0xff]   ;;  %v2887_v38 = vld [vmem:[%s3473_s4 + $0x8] sm:$0xff] }
  0xad   : > { %v395_v48 = vpack.c.bf16 %v381_v45, %v380_v44  ;;  %v2892_v39 = vld [vmem:[%s3473_s4] sm:$0xff]  ;;  %807 = vrot.lane.b32.xlu1 %v2887_v38, %s2652_s11  ;;  %v2450_v40 = vld [vmem:[#allocation2 + $0x288] ss:$12 sps:$4 sm:$0xff]   ;;  %v2452_v41 = vld [vmem:[#allocation2 + $0x28c] ss:$12 sps:$4 sm:$0xff]  }
  0xae   : > { %v384_v51 = vsel %vm377_vm1, %v319_v49, %v2426_v47  ;;  %v385_v52 = vsel %vm377_vm1, %v320_v50, %v2427_v46  ;;  %805 = vrot.lane.b32.xlu0 %v2892_v39, %s2652_s11  ;;  %v2898_v42 = vld [vmem:[#allocation2 + $0x290] ss:$12 sps:$4 sm:$0xff]   ;;  %1066 = vmatprep.subr.bf16.mxu1 %v2452_v41  ;;  %v2466_v50 = vld [vmem:[#allocation2 + $0x228] ss:$12 sps:$4 sm:$0xff]   ;;  %v337_v41 = vld [vmem:[%s3469_s0] sm:$0xff] }
  0xaf   : > { %2263 = vmatmul.mubr.msk.bf16.vlgmr.msra.gmra.mxu0 %vm427_vm2, %v395_v48  ;;  %v397_v53 = vpack.c.bf16 %v385_v52, %v384_v51  ;;  %v2454_v44 = vld [vmem:[#allocation2 + $0x270] ss:$12 sps:$4 sm:$0xff]   ;;  %v2458_v48 = vld [vmem:[#allocation2 + $0x258] ss:$12 sps:$4 sm:$0xff]   ;;  %v2472_v51 = vld [vmem:[#allocation2 + $0x214] ss:$12 sps:$4 sm:$0xff]  }
  0xb0   : > { %2266 = vmatprep.mubr.msk.bf16.mxu0 %vm427_vm2, %v396_v43  ;;  %2295 = vmatpush3.bf16.msra.mxu0 %v2442_v57  ;;  %v2456_v43 = vld [vmem:[#allocation2 + $0x274] ss:$12 sps:$4 sm:$0xff]   ;;  %v2460_v45 = vld [vmem:[#allocation2 + $0x25c] ss:$12 sps:$4 sm:$0xff]   ;;  %v2464_v49 = vld [vmem:[#allocation2 + $0x244] ss:$12 sps:$4 sm:$0xff]  }
  0xb1   : > { %2296 = vmatprep.subr.bf16.mxu0 %v2443_v58  ;;  %831 = vrot.lane.b32.xlu1 %v2801_v2, %s2653_s13  ;;  %v2912_v46 = vld [vmem:[%s3473_s4 + $0x18] sm:$0xff]  ;;  %v2917_v47 = vld [vmem:[%s3473_s4 + $0x10] sm:$0xff]  ;;  %v2934_v52 = vld [vmem:[%s3473_s4 + $0x28] sm:$0xff]  ;;  %vm1734_vm4 = vcmp.eq.s32.totalorder %v337_v41, 2  ;;  %vm1726_vm11 = vcmp.eq.s32.totalorder %v337_v41, 1 }
  0xb2   : > { %829 = vrot.lane.b32.xlu0 %v2796_v1, %s2653_s13 }
  0xb4   : > { %2297 = vmatpush3.bf16.msra.mxu0 %v2443_v58 }
  0xb5   : > { %2298 = vmatprep.subr.bf16.mxu0 %v2444_v59  ;;  %855 = vrot.lane.b32.xlu1 %v2801_v2, %s2654_s14  ;;  %v2468_v2 = vld [vmem:[#allocation2 + $0x22c] ss:$12 sps:$4 sm:$0xff]  }
  0xb6   : > { %853 = vrot.lane.b32.xlu0 %v2796_v1, %s2654_s14  ;;  %v2462_v1 = vld [vmem:[#allocation2 + $0x240] ss:$12 sps:$4 sm:$0xff]  }
  0xb7   : > { %2267 = vmatmul.mubr.msk.bf16.gmra.mxu0 %vm427_vm2, %v397_v53  ;;  %v2939_v53 = vld [vmem:[%s3473_s4 + $0x20] sm:$0xff] }
  0xb8   : > { %2299 = vmatpush3.bf16.msra.mxu0 %v2444_v59 }
  0xb9   : > { %2300 = vmatprep.subr.bf16.mxu0 %v2445_v60  ;;  %811 = vrot.lane.b32.xlu1 %v2912_v46, %s2652_s11 }
  0xba   : > { %809 = vrot.lane.b32.xlu0 %v2917_v47, %s2652_s11 }
  0xbc   : > { %2301 = vmatpush3.bf16.msra.mxu0 %v2445_v60 }
  0xbd   : > { %2302 = vmatprep.subr.bf16.mxu0 %v2446_v61  ;;  %835 = vrot.lane.b32.xlu1 %v2813_v5, %s2653_s13 }
  0xbe   : > { %833 = vrot.lane.b32.xlu0 %v2806_v3, %s2653_s13 }
  0xc0   : > { %2303 = vmatpush3.bf16.msra.mxu0 %v2446_v61 }
  0xc1   : > { %2304 = vmatprep.subr.bf16.mxu0 %v2447_v35  ;;  %859 = vrot.lane.b32.xlu1 %v2813_v5, %s2654_s14  ;;  %v2961_v5 = vld [vmem:[%s3473_s4 + $0x30] sm:$0xff] }
  0xc2   : > { %857 = vrot.lane.b32.xlu0 %v2806_v3, %s2654_s14  ;;  %v2956_v3 = vld [vmem:[%s3473_s4 + $0x38] sm:$0xff] }
  0xc4   : > { %2305 = vmatpush3.bf16.msra.mxu0 %v2447_v35  ;;  %v2484_v35 = vld [vmem:[#allocation2 + $0x34c] ss:$12 sps:$4 sm:$0xff]  }
  0xc5   : > { %2306 = vmatprep.subr.bf16.mxu0 %v2448_v36  ;;  %815 = vrot.lane.b32.xlu1 %v2934_v52, %s2652_s11 }
  0xc6   : > { %813 = vrot.lane.b32.xlu0 %v2939_v53, %s2652_s11 }
  0xc8   : > { %2307 = vmatpush3.bf16.msra.mxu0 %v2448_v36  ;;  %v2979_v36 = vld [vmem:[#allocation2 + $0x350] ss:$12 sps:$4 sm:$0xff]  }
  0xc9   : > { %2308 = vmatprep.subr.bf16.mxu0 %v2449_v37  ;;  %839 = vrot.lane.b32.xlu1 %v2823_v7, %s2653_s13 }
  0xca   : > { %837 = vrot.lane.b32.xlu0 %v2818_v6, %s2653_s13 }
  0xcc   : > { %2309 = vmatpush3.bf16.msra.mxu0 %v2449_v37  ;;  %v2655_v37 = vmov 0  }
  0xcd   : > { %2318 = vmatprep.subr.bf16.mxu0 %v2898_v42  ;;  %863 = vrot.lane.b32.xlu1 %v2823_v7, %s2654_s14 }
  0xce   : > { %861 = vrot.lane.b32.xlu0 %v2818_v6, %s2654_s14  ;;  %2429 = vset.pattern.permute.xlu1 %v2655_v37 }
  0xcf   : > { %2428 = vset.pattern.permute.xlu0 %v2655_v37 }
  0xd1   : > { %819 = vrot.lane.b32.xlu1 %v2956_v3, %s2652_s11 }
  0xd2   : > { %817 = vrot.lane.b32.xlu0 %v2961_v5, %s2652_s11 }
  0xd5   : > { %843 = vrot.lane.b32.xlu1 %v2835_v10, %s2653_s13 }
  0xd6   : > { %841 = vrot.lane.b32.xlu0 %v2830_v9, %s2653_s13 }
  0xd9   : > { %867 = vrot.lane.b32.xlu1 %v2835_v10, %s2654_s14 }
  0xda   : > { %865 = vrot.lane.b32.xlu0 %v2830_v9, %s2654_s14 }
 0x16f   : > { %v2264_v62 = vpop.f32.mrf.mxu0 }
 0x170   : > { %v483_v12 = vadd.f32 %v2264_v62, %v2097_v0 }
 0x171   : > { %v474_v63 = vpop.f32.mrf.mxu0 }
 0x172   : > { %v475_v8 = vadd.f32 %v2097_v0, %v474_v63  ;;  %v507_v19 = vmax.f32 %v483_v12, 0.0 }
 0x173   : > { %v2265_v4 = vpop.f32.mrf.mxu0 }
 0x174   : > { %v486_v11 = vadd.f32 %v2265_v4, %v2097_v0  ;;  %v505_v17 = vmax.f32 %v475_v8, 0.0 }
 0x175   : > { %v477_v13 = vpop.f32.mrf.mxu0 }
 0x176   : > { %v478_v14 = vadd.f32 %v2097_v0, %v477_v13  ;;  %v508_v15 = vmax.f32 %v486_v11, 0.0  ;;  %v2457_v13 = vld [vmem:[#allocation2 + $0x278] ss:$12 sps:$4 sm:$0xff]  }
 0x177   : > { %v2268_v16 = vpop.f32.mrf.mxu0 }
 0x178   : > { %v506_v18 = vmax.f32 %v478_v14, 0.0  ;;  %v499_v20 = vadd.f32 %v2268_v16, %v2097_v0  ;;  %v530_v24 = vpack.c.bf16 %v508_v15, %v507_v19 }
 0x179   : > { %v490_v21 = vpop.f32.mrf.mxu0 }
 0x17a   : > { %v491_v22 = vadd.f32 %v2097_v0, %v490_v21  ;;  %v529_v23 = vpack.c.bf16 %v506_v18, %v505_v17  ;;  %v511_v27 = vmax.f32 %v499_v20, 0.0  ;;  %v2461_v20 = vld [vmem:[#allocation2 + $0x260] ss:$12 sps:$4 sm:$0xff]  }
 0x17b   : > { %v2269_v25 = vpop.f32.mrf.mxu0 }
 0x17c   : > { %v502_v26 = vadd.f32 %v2269_v25, %v2097_v0  ;;  %2286 = vmatprep.mubr.bf16.mxu1 %v529_v23  ;;  %v509_v29 = vmax.f32 %v491_v22, 0.0 }
 0x17d   : > { %v493_v28 = vpop.f32.mrf.mxu0  ;;  %2287 = vmatmul.mubr.bf16.vlgmr.msra.gmra.mxu1 %v530_v24 }
 0x17e   : > { %v512_v30 = vmax.f32 %v502_v26, 0.0  ;;  %v494_v31 = vadd.f32 %v2097_v0, %v493_v28  ;;  %1067 = vmatpush1.bf16.msra.mxu1 %v2450_v40  ;;  %v2465_v26 = vld [vmem:[#allocation2 + $0x248] ss:$12 sps:$4 sm:$0xff]   ;;  %v2473_v28 = vld [vmem:[#allocation2 + $0x218] ss:$12 sps:$4 sm:$0xff]  }
 0x17f   : > { %1068 = vmatprep.subr.bf16.mxu1 %v2456_v43  ;;  %v338_v40 = vld [vmem:[%s3469_s0 + $0x8] sm:$0xff]  ;;  %v340_v43 = vld [vmem:[%s3469_s0 + $0x18] sm:$0xff] }
 0x180   : > { %v510_v32 = vmax.f32 %v494_v31, 0.0  ;;  %v532_v33 = vpack.c.bf16 %v512_v30, %v511_v27  ;;  %v2469_v27 = vld [vmem:[#allocation2 + $0x230] ss:$12 sps:$4 sm:$0xff]   ;;  %v2477_v30 = vld [vmem:[#allocation2 + $0x200] ss:$12 sps:$4 sm:$0xff]   ;;  %vm1735_vm3 = vcmp.eq.s32.totalorder %v338_v40, 2 }
 0x181   : > { %v2474_v31 = vld [vmem:[#allocation2 + $0x1f8] ss:$12 sps:$4 sm:$0xff]   ;;  %vm1737_vm6 = vcmp.eq.s32.totalorder %v340_v43, 2  ;;  %vm1727_vm12 = vcmp.eq.s32.totalorder %v338_v40, 1  ;;  %vm1729_vm14 = vcmp.eq.s32.totalorder %v340_v43, 1 }
 0x182   : > { %v531_v34 = vpack.c.bf16 %v510_v32, %v509_v29  ;;  %1069 = vmatpush1.bf16.msra.mxu1 %v2454_v44  ;;  %v2476_v29 = vld [vmem:[#allocation2 + $0x1fc] ss:$12 sps:$4 sm:$0xff]   ;;  %v2480_v32 = vld [vmem:[#allocation2 + $0x1e4] ss:$12 sps:$4 sm:$0xff]   ;;  %v1743_v44 = vsel %vm1735_vm3, 1, %v2655_v37 }
 0x183   : > { %1070 = vmatprep.subr.bf16.mxu1 %v2460_v45  ;;  %v1742_v45 = vsel %vm1734_vm4, 1, %v2655_v37  ;;  %1754 = vperm.xlu1 %2429, %v1743_v44  }
 0x184   : > { %2290 = vmatprep.mubr.bf16.mxu1 %v531_v34  ;;  %v2478_v34 = vld [vmem:[#allocation2 + $0x1e0] ss:$12 sps:$4 sm:$0xff]   ;;  %1751 = vperm.xlu0 %2428, %v1742_v45  }
 0x185   : > { %2291 = vmatmul.mubr.bf16.gmra.mxu1 %v532_v33  ;;  %v2481_v33 = vld [vmem:[#allocation2 + $0x1e8] ss:$12 sps:$4 sm:$0xff]  }
 0x186   : > { %1071 = vmatpush1.bf16.msra.mxu1 %v2458_v48  ;;  %1098 = vmatprep.mubr.bf16.mxu1 %v2655_v37  ;;  %v341_v48 = vld [vmem:[%s3469_s0 + $0x20] sm:$0xff] }
 0x187   : > { %1072 = vmatprep.subr.bf16.mxu1 %v2464_v49  ;;  %v342_v49 = vld [vmem:[%s3469_s0 + $0x28] sm:$0xff]  ;;  %vm1738_vm7 = vcmp.eq.s32.totalorder %v341_v48, 2  ;;  %vm1730_vm15 = vcmp.eq.s32.totalorder %v341_v48, 1 }
 0x188   : > { %vm1739_vm8 = vcmp.eq.s32.totalorder %v342_v49, 2  ;;  %vm1731_vm0 = vcmp.eq.s32.totalorder %v342_v49, 1  ;;  %v2493_v49 = vld [vmem:[#allocation2 + $0x320] ss:$12 sps:$4 sm:$0xff]  }
 0x18a   : > { %1073 = vmatpush1.bf16.msra.mxu1 %v2462_v1 }
 0x18b   : > { %1074 = vmatprep.subr.bf16.mxu1 %v2468_v2  ;;  %v1745_v2 = vsel %vm1737_vm6, 1, %v2655_v37 }
 0x18c   : > { %1760 = vperm.xlu0 %2428, %v1745_v2  }
 0x18e   : > { %1075 = vmatpush1.bf16.msra.mxu1 %v2466_v50  ;;  %v343_v50 = vld [vmem:[%s3469_s0 + $0x30] sm:$0xff] }
 0x18f   : > { %1076 = vmatprep.subr.bf16.mxu1 %v2472_v51  ;;  %v344_v51 = vld [vmem:[%s3469_s0 + $0x38] sm:$0xff]  ;;  %vm1740_vm9 = vcmp.eq.s32.totalorder %v343_v50, 2  ;;  %vm1732_vm3 = vcmp.eq.s32.totalorder %v343_v50, 1 }
 0x190   : > { %vm1741_vm10 = vcmp.eq.s32.totalorder %v344_v51, 2  ;;  %vm1733_vm4 = vcmp.eq.s32.totalorder %v344_v51, 1 }
 0x192   : > { %1077 = vmatpush1.bf16.msra.mxu1 %v2470_v54  ;;  %v1746_v54 = vsel %vm1738_vm7, 1, %v2655_v37 }
 0x193   : > { %1078 = vmatprep.subr.bf16.mxu1 %v2476_v29 }
 0x196   : > { %1079 = vmatpush1.bf16.msra.mxu1 %v2474_v31 }
 0x197   : > { %1080 = vmatprep.subr.bf16.mxu1 %v2480_v32  ;;  %v2488_v32 = vld [vmem:[#allocation2 + $0x334] ss:$12 sps:$4 sm:$0xff]  }
 0x19a   : > { %1081 = vmatpush1.bf16.msra.mxu1 %v2478_v34 }
 0x19b   : > { %1368 = vmatprep.subr.bf16.mxu1 %v2484_v35  ;;  %v2489_v35 = vld [vmem:[#allocation2 + $0x338] ss:$12 sps:$4 sm:$0xff]  }
 0x23d   : > { %v2288_v6 = vpop.f32.mrf.mxu1 }
 0x23e   : > { %v629_v59 = vadd.f32 %v2288_v6, %v2106_v55  ;;  %v1747_v6 = vsel %vm1739_vm8, 1, %v2655_v37 }
 0x23f   : > { %v620_v7 = vpop.f32.mrf.mxu1  ;;  %1766 = vperm.xlu0 %2428, %v1747_v6  }
 0x240   : > { %v621_v57 = vadd.f32 %v2106_v55, %v620_v7  ;;  %v653_v10 = vmax.f32 %v629_v59, 0.0  ;;  %v1748_v7 = vsel %vm1740_vm9, 1, %v2655_v37  ;;  %v1793_v59 = vsel %vm1729_vm14, 1, %v2655_v37 }
 0x241   : > { %v2289_v56 = vpop.f32.mrf.mxu1 }
 0x242   : > { %v632_v58 = vadd.f32 %v2289_v56, %v2106_v55  ;;  %v651_v0 = vmax.f32 %v621_v57, 0.0  ;;  %v1790_v56 = vsel %vm1726_vm11, 1, %v2655_v37  ;;  %v1791_v57 = vsel %vm1727_vm12, 1, %v2655_v37 }
 0x243   : > { %v623_v60 = vpop.f32.mrf.mxu1 }
 0x244   : > { %v624_v61 = vadd.f32 %v2106_v55, %v623_v60  ;;  %v654_v62 = vmax.f32 %v632_v58, 0.0  ;;  %v1794_v60 = vsel %vm1730_vm15, 1, %v2655_v37 }
 0x245   : > { %v2292_v63 = vpop.f32.mrf.mxu1 }
 0x246   : > { %v652_v4 = vmax.f32 %v624_v61, 0.0  ;;  %v676_v9 = vpack.c.bf16 %v654_v62, %v653_v10  ;;  %v645_v16 = vadd.f32 %v2292_v63, %v2106_v55  ;;  %v1795_v61 = vsel %vm1731_vm0, 1, %v2655_v37 }
 0x247   : > { %v636_v8 = vpop.f32.mrf.mxu1  ;;  %v1796_v62 = vsel %vm1732_vm3, 1, %v2655_v37  ;;  %v1797_v63 = vsel %vm1733_vm4, 1, %v2655_v37 }
 0x248   : > { %v675_v11 = vpack.c.bf16 %v652_v4, %v651_v0  ;;  %v637_v14 = vadd.f32 %v2106_v55, %v636_v8  ;;  %v657_v23 = vmax.f32 %v645_v16, 0.0  ;;  %v3025_v0 = vpop.permute.xlu1 %807  ;;  %v3027_v4 = vpop.permute.xlu0 %805 }
 0x249   : > { %v2293_v12 = vpop.f32.mrf.mxu1  ;;  %v877_v31 = vsel %vm377_vm1, %v2892_v39, %v3027_v4  ;;  %v2492_v39 = vld [vmem:[#allocation2 + $0x31c] ss:$12 sps:$4 sm:$0xff]  }
 0x24a   : > { %v648_v15 = vadd.f32 %v2293_v12, %v2106_v55  ;;  %2310 = vmatprep.mubr.bf16.mxu0 %v675_v11  ;;  %v655_v21 = vmax.f32 %v637_v14, 0.0 }
 0x24b   : > { %v639_v17 = vpop.f32.mrf.mxu1  ;;  %2311 = vmatmul.mubr.bf16.vlgmr.msra.gmra.mxu0 %v676_v9 }
 0x24c   : > { %v640_v18 = vadd.f32 %v2106_v55, %v639_v17  ;;  %2319 = vmatpush3.bf16.msra.mxu0 %v2898_v42  ;;  %v658_v19 = vmax.f32 %v648_v15, 0.0  ;;  %v339_v42 = vld [vmem:[%s3469_s0 + $0x10] sm:$0xff]  ;;  %v1749_v55 = vsel %vm1741_vm10, 1, %v2655_v37  ;;  %v832_v10 = vpop.permute.xlu1 %831  ;;  %v830_v8 = vpop.permute.xlu0 %829 }
 0x24d   : > { %2320 = vmatprep.subr.bf16.mxu0 %v2457_v13  ;;  %vm1736_vm5 = vcmp.eq.s32.totalorder %v339_v42, 2  ;;  %1772 = vperm.xlu0 %2428, %v1749_v55   ;;  %vm1728_vm13 = vcmp.eq.s32.totalorder %v339_v42, 1  ;;  %v885_v42 = vsel %vm427_vm2, %v877_v31, %v830_v8  ;;  %v2513_v31 = vld [vmem:[#allocation2 + $0x2a8] ss:$12 sps:$4 sm:$0xff]  }
 0x24e   : > { %v656_v22 = vmax.f32 %v640_v18, 0.0  ;;  %v678_v25 = vpack.c.bf16 %v658_v19, %v657_v23  ;;  %v1744_v1 = vsel %vm1736_vm5, 1, %v2655_v37  ;;  %v1792_v58 = vsel %vm1728_vm13, 1, %v2655_v37  ;;  %v2115_v19 = vld [vmem:[%s3472_s3 + $0x2] ss:$0 sm:$0xff] }
 0x24f   : > { %1757 = vperm.xlu1 %2429, %v1744_v1   ;;  %vm893_vm5 = vcmask 785408  }
 0x250   : > { %v677_v24 = vpack.c.bf16 %v656_v22, %v655_v21  ;;  %2321 = vmatpush3.bf16.msra.mxu0 %v2457_v13  ;;  %v3029_v11 = vpop.permute.xlu1 %855  ;;  %v3031_v9 = vpop.permute.xlu0 %853 }
 0x251   : > { %2322 = vmatprep.subr.bf16.mxu0 %v2461_v20  ;;  %1802 = vperm.xlu0 %2428, %v1791_v57   ;;  %v3068_v51 = vsel %vm893_vm5, %v885_v42, %v3031_v9  ;;  %v2497_v57 = vld [vmem:[#allocation2 + $0x308] ss:$12 sps:$4 sm:$0xff]  }
 0x252   : > { %2314 = vmatprep.mubr.bf16.mxu0 %v677_v24 }
 0x253   : > { %2315 = vmatmul.mubr.bf16.gmra.mxu0 %v678_v25  ;;  %1763 = vperm.xlu1 %2429, %v1746_v54  }
 0x254   : > { %2323 = vmatpush3.bf16.msra.mxu0 %v2461_v20  ;;  %v3033_v12 = vpop.permute.xlu1 %811  ;;  %v3035_v13 = vpop.permute.xlu0 %809 }
 0x255   : > { %2324 = vmatprep.subr.bf16.mxu0 %v2465_v26  ;;  %1808 = vperm.xlu0 %2428, %v1793_v59  }
 0x257   : > { %1769 = vperm.xlu1 %2429, %v1748_v7   ;;  %v2496_v7 = vld [vmem:[#allocation2 + $0x304] ss:$12 sps:$4 sm:$0xff]  }
 0x258   : > { %2325 = vmatpush3.bf16.msra.mxu0 %v2465_v26  ;;  %v3037_v14 = vpop.permute.xlu1 %835  ;;  %v3039_v16 = vpop.permute.xlu0 %833 }
 0x259   : > { %2326 = vmatprep.subr.bf16.mxu0 %v2469_v27  ;;  %1814 = vperm.xlu0 %2428, %v1795_v61   ;;  %v2500_v61 = vld [vmem:[#allocation2 + $0x2ec] ss:$12 sps:$4 sm:$0xff]  }
 0x25b   : > { %1799 = vperm.xlu1 %2429, %v1790_v56  }
 0x25c   : > { %2327 = vmatpush3.bf16.msra.mxu0 %v2469_v27  ;;  %v3044_v20 = vpop.permute.xlu1 %859  ;;  %v3046_v23 = vpop.permute.xlu0 %857 }
 0x25d   : > { %2328 = vmatprep.subr.bf16.mxu0 %v2473_v28  ;;  %1820 = vperm.xlu0 %2428, %v1797_v63   ;;  %v2498_v63 = vld [vmem:[#allocation2 + $0x2e8] ss:$12 sps:$4 sm:$0xff]  }
 0x25f   : > { %1805 = vperm.xlu1 %2429, %v1792_v58  }
 0x260   : > { %2329 = vmatpush3.bf16.msra.mxu0 %v2473_v28  ;;  %v2482_v28 = vld [vmem:[#allocation2 + $0x348] ss:$12 sps:$4 sm:$0xff]   ;;  %v3054_v40 = vpop.permute.xlu1 %815  ;;  %v3058_v44 = vpop.permute.xlu0 %813 }
 0x261   : > { %2330 = vmatprep.subr.bf16.mxu0 %v2477_v30 }
 0x263   : > { %1811 = vperm.xlu1 %2429, %v1794_v60   ;;  %v2494_v60 = vld [vmem:[#allocation2 + $0x300] ss:$12 sps:$4 sm:$0xff]  }
 0x264   : > { %2331 = vmatpush3.bf16.msra.mxu0 %v2477_v30  ;;  %v878_v30 = vsel %vm377_vm1, %v2887_v38, %v3025_v0  ;;  %v2486_v38 = vld [vmem:[#allocation2 + $0x330] ss:$12 sps:$4 sm:$0xff]   ;;  %v840_v58 = vpop.permute.xlu1 %839  ;;  %v838_v59 = vpop.permute.xlu0 %837 }
 0x265   : > { %2332 = vmatprep.subr.bf16.mxu0 %v2481_v33  ;;  %v886_v41 = vsel %vm427_vm2, %v878_v30, %v832_v10  ;;  %v2512_v30 = vld [vmem:[#allocation2 + $0x2a4] ss:$12 sps:$4 sm:$0xff]  }
 0x266   : > { %v3064_v50 = vsel %vm893_vm5, %v886_v41, %v3029_v11 }
 0x267   : > { %1817 = vperm.xlu1 %2429, %v1796_v62   ;;  %v3072_v56 = vpack.c.bf16 %v3064_v50, %v3068_v51  ;;  %v2501_v62 = vld [vmem:[#allocation2 + $0x2f0] ss:$12 sps:$4 sm:$0xff]  }
 0x268   : > { %2333 = vmatpush3.bf16.msra.mxu0 %v2481_v33  ;;  %v3076_v10 = vpop.permute.xlu1 %863  ;;  %v3078_v8 = vpop.permute.xlu0 %861 }
 0x269   : > { %2342 = vmatprep.subr.bf16.mxu0 %v2979_v36 }
 0x30b   : > { %v2312_v15 = vpop.f32.mrf.mxu0 }
 0x30c   : > { %v775_v26 = vadd.f32 %v2312_v15, %v2115_v19  ;;  %v2504_v15 = vld [vmem:[#allocation2 + $0x2d4] ss:$12 sps:$4 sm:$0xff]  }
 0x30d   : > { %v766_v17 = vpop.f32.mrf.mxu0 }
 0x30e   : > { %v767_v24 = vadd.f32 %v2115_v19, %v766_v17  ;;  %v2505_v17 = vld [vmem:[#allocation2 + $0x2d8] ss:$12 sps:$4 sm:$0xff]  }
 0x30f   : > { %v2313_v18 = vpop.f32.mrf.mxu0 }
 0x310   : > { %v778_v21 = vadd.f32 %v2313_v18, %v2115_v19  ;;  %v2502_v18 = vld [vmem:[#allocation2 + $0x2d0] ss:$12 sps:$4 sm:$0xff]  }
 0x311   : > { %v769_v22 = vpop.f32.mrf.mxu0 }
 0x312   : > { %v770_v25 = vadd.f32 %v2115_v19, %v769_v22  ;;  %v935_v33 = vpack.c.bf16 %v778_v21, %v775_v26  ;;  %v2509_v21 = vld [vmem:[#allocation2 + $0x2c0] ss:$12 sps:$4 sm:$0xff]   ;;  %v3081_v22 = vpop.permute.xlu1 %819  ;;  %v881_v26 = vsel %vm377_vm1, %v2939_v53, %v3058_v44 }
 0x313   : > { %v2316_v27 = vpop.f32.mrf.mxu0  ;;  %v884_v42 = vsel %vm377_vm1, %v2956_v3, %v3081_v22 }
 0x314   : > { %v934_v29 = vpack.c.bf16 %v770_v25, %v767_v24  ;;  %v791_v54 = vadd.f32 %v2316_v27, %v2115_v19  ;;  %v3083_v24 = vpop.permute.xlu0 %817  ;;  %v882_v25 = vsel %vm377_vm1, %v2934_v52, %v3054_v40  ;;  %v2506_v27 = vld [vmem:[#allocation2 + $0x2b8] ss:$12 sps:$4 sm:$0xff]  }
 0x315   : > { %v782_v34 = vpop.f32.mrf.mxu0  ;;  %v890_v52 = vsel %vm427_vm2, %v882_v25, %v840_v58  ;;  %v3171_v25 = vld [vmem:[%s3472_s3 + $0x3] ss:$0 sm:$0xff] }
 0x316   : > { %1099 = vmatmul.mubr.bf16.vlgmr.msra.gmra.mxu1 %v934_v29  ;;  %2334 = vmatprep.mubr.bf16.mxu0 %v934_v29  ;;  %v783_v1 = vadd.f32 %v2115_v19, %v782_v34  ;;  %v879_v29 = vsel %vm377_vm1, %v2917_v47, %v3035_v13  ;;  %v844_v47 = vpop.permute.xlu1 %843 }
 0x317   : > { %1369 = vmatpush1.bf16.msra.mxu1 %v2482_v28  ;;  %v2317_v43 = vpop.f32.mrf.mxu0  ;;  %2335 = vmatmul.mubr.bf16.vlgmr.msra.gmra.mxu0 %v935_v33  ;;  %v880_v28 = vsel %vm377_vm1, %v2912_v46, %v3033_v12  ;;  %v887_v46 = vsel %vm427_vm2, %v879_v29, %v3039_v16  ;;  %v3178_v29 = vld [vmem:[%s3472_s3 + $0x4] ss:$0 sm:$0xff] }
 0x318   : > { %2343 = vmatpush3.bf16.msra.mxu0 %v2979_v36  ;;  %1370 = vmatprep.subr.bf16.mxu1 %v2488_v32  ;;  %v794_v45 = vadd.f32 %v2317_v43, %v2115_v19  ;;  %v2490_v36 = vld [vmem:[#allocation2 + $0x318] ss:$12 sps:$4 sm:$0xff]   ;;  %v889_v32 = vsel %vm427_vm2, %v881_v26, %v838_v59  ;;  %v888_v53 = vsel %vm427_vm2, %v880_v28, %v3037_v14  ;;  %v842_v34 = vpop.permute.xlu0 %841 }
 0x319   : > { %v785_v48 = vpop.f32.mrf.mxu0  ;;  %2344 = vmatprep.subr.bf16.mxu0 %v2489_v35  ;;  %1108 = vmatprep.mubr.bf16.mxu1 %v2655_v37  ;;  %v3110_v41 = vsel %vm893_vm5, %v889_v32, %v3078_v8  ;;  %v3114_v14 = vsel %vm893_vm5, %v888_v53, %v3044_v20  ;;  %v3118_v16 = vsel %vm893_vm5, %v887_v46, %v3046_v23 }
 0x31a   : > { %v786_v2 = vadd.f32 %v2115_v19, %v785_v48  ;;  %v937_v55 = vpack.c.bf16 %v794_v45, %v791_v54  ;;  %v2508_v19 = vld [vmem:[#allocation2 + $0x2bc] ss:$12 sps:$4 sm:$0xff]   ;;  %v883_v43 = vsel %vm377_vm1, %v2961_v5, %v3083_v24  ;;  %v892_v45 = vsel %vm427_vm2, %v884_v42, %v844_v47 }
 0x31b   : > { %1371 = vmatpush1.bf16.msra.mxu1 %v2486_v38  ;;  %v891_v48 = vsel %vm427_vm2, %v883_v43, %v842_v34 }
 0x31c   : > { %v936_v6 = vpack.c.bf16 %v786_v2, %v783_v1  ;;  %2345 = vmatpush3.bf16.msra.mxu0 %v2489_v35  ;;  %1372 = vmatprep.subr.bf16.mxu1 %v2492_v39  ;;  %v3106_v35 = vsel %vm893_vm5, %v890_v52, %v3076_v10  ;;  %v1237_v39 = vpack.c.bf16 %v3114_v14, %v3118_v16  ;;  %v3134_v1 = vpop.permute.xlu0 %865 }
 0x31d   : > { %2346 = vmatprep.subr.bf16.mxu0 %v2493_v49  ;;  %v1238_v38 = vpack.c.bf16 %v3106_v35, %v3110_v41  ;;  %v3144_v5 = vsel %vm893_vm5, %v891_v48, %v3134_v1 }
 0x31e   : > { %1109 = vmatmul.mubr.bf16.gmra.mxu1 %v935_v33  ;;  %2338 = vmatprep.mubr.bf16.mxu0 %v936_v6  ;;  %v2510_v33 = vld [vmem:[#allocation2 + $0x2a0] ss:$12 sps:$4 sm:$0xff]  }
 0x31f   : > { %1373 = vmatpush1.bf16.msra.mxu1 %v2490_v36  ;;  %2339 = vmatmul.mubr.bf16.gmra.mxu0 %v937_v55 }
 0x320   : > { %2347 = vmatpush3.bf16.msra.mxu0 %v2493_v49  ;;  %1374 = vmatprep.subr.bf16.mxu1 %v2496_v7  ;;  %v3132_v49 = vpop.permute.xlu1 %867 }
 0x321   : > { %2348 = vmatprep.subr.bf16.mxu0 %v2497_v57  ;;  %2358 = vmatprep.mubr.bf16.mxu0 %v3072_v56  ;;  %v3140_v3 = vsel %vm893_vm5, %v892_v45, %v3132_v49 }
 0x322   : > { %1118 = vmatprep.mubr.bf16.mxu1 %v2655_v37  ;;  %v1239_v2 = vpack.c.bf16 %v3140_v3, %v3144_v5 }
 0x323   : > { %1375 = vmatpush1.bf16.msra.mxu1 %v2494_v60 }
 0x324   : > { %2349 = vmatpush3.bf16.msra.mxu0 %v2497_v57  ;;  %1376 = vmatprep.subr.bf16.mxu1 %v2500_v61 }
 0x325   : > { %2350 = vmatprep.subr.bf16.mxu0 %v2501_v62 }
 0x326   : > { %1119 = vmatmul.mubr.bf16.gmra.mxu1 %v936_v6 }
 0x327   : > { %1377 = vmatpush1.bf16.msra.mxu1 %v2498_v63  ;;  %1128 = vmatprep.mubr.bf16.mxu1 %v2655_v37 }
 0x328   : > { %2351 = vmatpush3.bf16.msra.mxu0 %v2501_v62  ;;  %1378 = vmatprep.subr.bf16.mxu1 %v2504_v15 }
 0x329   : > { %2352 = vmatprep.subr.bf16.mxu0 %v2505_v17 }
 0x32b   : > { %1379 = vmatpush1.bf16.msra.mxu1 %v2502_v18 }
 0x32c   : > { %2353 = vmatpush3.bf16.msra.mxu0 %v2505_v17  ;;  %1380 = vmatprep.subr.bf16.mxu1 %v2508_v19 }
 0x32d   : > { %2354 = vmatprep.subr.bf16.mxu0 %v2509_v21 }
 0x32e   : > { %1129 = vmatmul.mubr.bf16.gmra.mxu1 %v937_v55 }
 0x32f   : > { %1381 = vmatpush1.bf16.msra.mxu1 %v2506_v27  ;;  %1400 = vmatprep.mubr.bf16.mxu1 %v2655_v37 }
 0x330   : > { %2355 = vmatpush3.bf16.msra.mxu0 %v2509_v21  ;;  %1382 = vmatprep.subr.bf16.mxu1 %v2512_v30 }
 0x331   : > { %2356 = vmatprep.subr.bf16.mxu0 %v2513_v31 }
 0x333   : > { %1383 = vmatpush1.bf16.msra.mxu1 %v2510_v33 }
 0x334   : > { %2357 = vmatpush3.bf16.msra.mxu0 %v2513_v31 }
 0x336   : > { %1401 = vmatmul.mubr.bf16.vlgmr.msra.gmra.mxu1 %v3072_v56 }
 0x337   : > { %2359 = vmatmul.mubr.bf16.vlgmr.msra.gmra.mxu0 %v1237_v39  ;;  %1410 = vmatprep.mubr.bf16.mxu1 %v2655_v37 }
 0x338   : > { %2362 = vmatprep.mubr.bf16.mxu0 %v1238_v38 }
 0x33e   : > { %1411 = vmatmul.mubr.bf16.gmra.mxu1 %v1237_v39 }
 0x33f   : > { %2363 = vmatmul.mubr.bf16.gmra.mxu0 %v1239_v2  ;;  %1420 = vmatprep.mubr.bf16.mxu1 %v2655_v37 }
 0x346   : > { %1421 = vmatmul.mubr.bf16.gmra.mxu1 %v1238_v38 }
 0x347   : > { %1430 = vmatprep.mubr.bf16.mxu1 %v2655_v37 }
 0x34e   : > { %1431 = vmatmul.mubr.bf16.gmra.mxu1 %v1239_v2 }
 0x3d6   : > { %v1100_v54 = vpop.f32.mrf.mxu1 }
 0x3d7   : > { %v3158_v15 = vpop.f32.mrf.mxu0 }
 0x3d8   : > { %v1102_v36 = vpop.f32.mrf.mxu1 }
 0x3d9   : > { %v3164_v18 = vpop.f32.mrf.mxu0 }
 0x3da   : > { %v1104_v6 = vpop.f32.mrf.mxu1 }
 0x3db   : > { %v3173_v27 = vpop.f32.mrf.mxu0 }
 0x3dc   : > { %v1106_v7 = vpop.f32.mrf.mxu1 }
 0x3dd   : > { %v3182_v33 = vpop.f32.mrf.mxu0 }
 0x3de   : > { %v1110_v55 = vpop.f32.mrf.mxu1 }
 0x3df   : > { %v3185_v48 = vpop.f32.mrf.mxu0 }
 0x3e0   : > { %v1112_v56 = vpop.f32.mrf.mxu1 }
 0x3e2   : > { %v1114_v57 = vpop.f32.mrf.mxu1 }
 0x3e4   : > { %v1116_v58 = vpop.f32.mrf.mxu1 }
 0x3e6   : > { %v1120_v59 = vpop.f32.mrf.mxu1 }
 0x3e8   : > { %v3150_v60 = vpop.f32.mrf.mxu1 }
 0x3ea   : > { %v3152_v61 = vpop.f32.mrf.mxu1 }
 0x3ec   : > { %v3154_v62 = vpop.f32.mrf.mxu1 }
 0x3ee   : > { %v3156_v63 = vpop.f32.mrf.mxu1 }
 0x3f0   : > { %v3160_v37 = vpop.f32.mrf.mxu1 }
 0x3f2   : > { %v3162_v17 = vpop.f32.mrf.mxu1 }
 0x3f4   : > { %v3166_v19 = vpop.f32.mrf.mxu1 }
 0x3f6   : > { %v1402_v21 = vpop.f32.mrf.mxu1 }
 0x3f7   : > { %v1506_v26 = vadd.f32 %v1402_v21, %v1100_v54 }
 0x3f8   : > { %v1404_v28 = vpop.f32.mrf.mxu1 }
 0x3f9   : > { %v1519_v30 = vadd.f32 %v3171_v25, %v1506_v26  ;;  %v1575_v31 = vadd.f32 %v1404_v28, %v1102_v36 }
 0x3fa   : > { %v1406_v52 = vpop.f32.mrf.mxu1 }
 0x3fb   : > { %v2173_v32 = vmul.f32 -1.442695, %v1519_v30  ;;  %v1588_v53 = vadd.f32 %v3178_v29, %v1575_v31  ;;  %v1507_v46 = vadd.f32 %v1406_v52, %v1104_v6  ;;  %v3189_v30 = vpop.f32.mrf.mxu0 }
 0x3fc   : > { %v1408_v47 = vpop.f32.mrf.mxu1 }
 0x3fd   : > { %2514 = vpow2.f32 %v2173_v32  ;;  %v1520_v34 = vadd.f32 %v3171_v25, %v1507_v46  ;;  %v1576_v42 = vadd.f32 %v1408_v47, %v1106_v7  ;;  %v2182_v43 = vmul.f32 -1.442695, %v1588_v53 }
 0x3fe   : > { %v1412_v38 = vpop.f32.mrf.mxu1 }
 0x3ff   : > { %v2174_v39 = vmul.f32 -1.442695, %v1520_v34  ;;  %v1508_v45 = vadd.f32 %v1412_v38, %v1110_v55  ;;  %v1589_v2 = vadd.f32 %v3178_v29, %v1576_v42  ;;  %v3193_v34 = vpop.f32.mrf.mxu0 }
 0x400   : > { %v1414_v54 = vpop.f32.mrf.mxu1 }
 0x401   : > { %2516 = vpow2.f32 %v2174_v39  ;;  %v1521_v36 = vadd.f32 %v3171_v25, %v1508_v45  ;;  %v1577_v6 = vadd.f32 %v1414_v54, %v1112_v56  ;;  %v2183_v7 = vmul.f32 -1.442695, %v1589_v2  ;;  %v3197_v54 = vpop.f32.mrf.mxu0 }
 0x402   : > { %2518 = vpow2.f32 %v2182_v43  ;;  %v1416_v21 = vpop.f32.mrf.mxu1 }
 0x403   : > { %v2175_v26 = vmul.f32 -1.442695, %v1521_v36  ;;  %v1509_v28 = vadd.f32 %v1416_v21, %v1114_v57  ;;  %v1590_v31 = vadd.f32 %v3178_v29, %v1577_v6 }
 0x404   : > { %v1418_v52 = vpop.f32.mrf.mxu1 }
 0x405   : > { %2520 = vpow2.f32 %v2175_v26  ;;  %v1522_v55 = vadd.f32 %v3171_v25, %v1509_v28  ;;  %v1578_v32 = vadd.f32 %v1418_v52, %v1116_v58  ;;  %v2184_v56 = vmul.f32 -1.442695, %v1590_v31  ;;  %v3201_v26 = vpop.f32.mrf.mxu0 }
 0x406   : > { %v1422_v53 = vpop.f32.mrf.mxu1  ;;  %2522 = vpow2.f32 %v2183_v7 }
 0x407   : > { %v2176_v46 = vmul.f32 -1.442695, %v1522_v55  ;;  %v1510_v47 = vadd.f32 %v1422_v53, %v1120_v59  ;;  %v1591_v42 = vadd.f32 %v3178_v29, %v1578_v32 }
 0x408   : > { %v1424_v57 = vpop.f32.mrf.mxu1 }
 0x409   : > { %2524 = vpow2.f32 %v2176_v46  ;;  %v1523_v43 = vadd.f32 %v3171_v25, %v1510_v47  ;;  %v2185_v58 = vmul.f32 -1.442695, %v1591_v42  ;;  %v1579_v59 = vadd.f32 %v1424_v57, %v3150_v60  ;;  %v1475_v42 = vpop.f32.mrf.mxu0 }
 0x40a   : > { %v2515_v38 = vpop.eup %2514  ;;  %v1426_v39 = vpop.f32.mrf.mxu1  ;;  %2526 = vpow2.f32 %v2184_v56 }
 0x40b   : > { %v1551_v45 = vadd.f32 1.0, %v2515_v38  ;;  %v2177_v2 = vmul.f32 -1.442695, %v1523_v43  ;;  %v1511_v36 = vadd.f32 %v1426_v39, %v3152_v61  ;;  %v1592_v60 = vadd.f32 %v3178_v29, %v1579_v59 }
 0x40c   : > { %v1428_v6 = vpop.f32.mrf.mxu1 }
 0x40d   : > { %2528 = vrcp.f32 %v1551_v45  ;;  %v1524_v28 = vadd.f32 %v3171_v25, %v1511_v36  ;;  %v1580_v55 = vadd.f32 %v1428_v6, %v3154_v62  ;;  %v2186_v45 = vmul.f32 -1.442695, %v1592_v60 }
 0x40e   : > { %v2517_v21 = vpop.eup %2516  ;;  %2530 = vpow2.f32 %v2177_v2  ;;  %v1432_v7 = vpop.f32.mrf.mxu1 }
 0x40f   : > { %v2519_v31 = vpop.eup %2518  ;;  %v1552_v52 = vadd.f32 1.0, %v2517_v21  ;;  %v1512_v32 = vadd.f32 %v1432_v7, %v3156_v63  ;;  %2532 = vpow2.f32 %v2185_v58  ;;  %v2178_v53 = vmul.f32 -1.442695, %v1524_v28  ;;  %v2361_v28 = vpop.f32.mrf.mxu0 }
 0x410   : > { %v1434_v61 = vpop.f32.mrf.mxu1  ;;  %v1620_v56 = vadd.f32 1.0, %v2519_v31  ;;  %v1593_v62 = vadd.f32 %v3178_v29, %v1580_v55 }
 0x411   : > { %2534 = vrcp.f32 %v1552_v52  ;;  %v1525_v46 = vadd.f32 %v3171_v25, %v1512_v32  ;;  %v1581_v57 = vadd.f32 %v1434_v61, %v3160_v37  ;;  %v1478_v61 = vpop.f32.mrf.mxu0 }
 0x412   : > { %v2521_v47 = vpop.eup %2520  ;;  %2536 = vpow2.f32 %v2178_v53  ;;  %v1436_v43 = vpop.f32.mrf.mxu1  ;;  %v2187_v7 = vmul.f32 -1.442695, %v1593_v62  ;;  %v3224_v53 = vld [vmem:[%s3472_s3 + $0x5] ss:$0 sm:$0xff] }
 0x413   : > { %v1553_v38 = vadd.f32 1.0, %v2521_v47  ;;  %v2179_v39 = vmul.f32 -1.442695, %v1525_v46  ;;  %v1513_v63 = vadd.f32 %v1436_v43, %v3162_v17  ;;  %v2523_v58 = vpop.eup %2522  ;;  %v1594_v59 = vadd.f32 %v3178_v29, %v1581_v57  ;;  %v3217_v17 = vld [vmem:[%s3472_s3 + $0x6] ss:$0 sm:$0xff] }
 0x414   : > { %v1438_v2 = vpop.f32.mrf.mxu1  ;;  %v1621_v52 = vadd.f32 1.0, %v2523_v58  ;;  %v1662_v32 = vadd.f32 %v3217_v17, %v1475_v42  ;;  %v1649_v47 = vadd.f32 %v3224_v53, %v3164_v18  ;;  %v3231_v18 = vpop.f32.mrf.mxu0 }
 0x415   : > { %2538 = vrcp.f32 %v1553_v38  ;;  %v1526_v36 = vadd.f32 %v3171_v25, %v1513_v63  ;;  %v1582_v6 = vadd.f32 %v1438_v2, %v3166_v19  ;;  %v2188_v25 = vmul.f32 -1.442695, %v1594_v59 }
 0x416   : > { %v2525_v21 = vpop.eup %2524  ;;  %2540 = vpow2.f32 %v2179_v39  ;;  %v1664_v59 = vadd.f32 %v3201_v26, %v3217_v17 }
 0x417   : > { %2542 = vrcp.f32 %v1620_v56  ;;  %v1554_v37 = vadd.f32 1.0, %v2525_v21  ;;  %v2180_v31 = vmul.f32 -1.442695, %v1526_v36  ;;  %v2527_v55 = vpop.eup %2526  ;;  %v1595_v19 = vadd.f32 %v3178_v29, %v1582_v6 }
 0x418   : > { %2544 = vpow2.f32 %v2186_v45  ;;  %v1622_v42 = vadd.f32 1.0, %v2527_v55  ;;  %v1663_v29 = vadd.f32 %v3217_v17, %v1478_v61  ;;  %v1650_v45 = vadd.f32 %v3224_v53, %v3182_v33 }
 0x419   : > { %2546 = vrcp.f32 %v1554_v37  ;;  %v2189_v62 = vmul.f32 -1.442695, %v1595_v19  ;;  %v1652_v61 = vadd.f32 %v3173_v27, %v3224_v53  ;;  %v1653_v27 = vadd.f32 %v3224_v53, %v3189_v30 }
 0x41a   : > { %v2529_v60 = vpop.eup %2528  ;;  %2548 = vpow2.f32 %v2180_v31  ;;  %v1491_v31 = vpop.f32.mrf.mxu0 }
 0x41b   : > { %v2531_v46 = vpop.eup %2530  ;;  %v1670_v56 = vmul.f32 %v2529_v60, %v1662_v32  ;;  %2550 = vpow2.f32 %v2187_v7  ;;  %v1651_v7 = vadd.f32 %v3158_v15, %v3224_v53 }
 0x41c   : > { %2552 = vrcp.f32 %v1621_v52  ;;  %v1555_v57 = vadd.f32 1.0, %v2531_v46  ;;  %v2533_v43 = vpop.eup %2532 }
 0x41d   : > { %v1678_v38 = vadd.f32 %v1670_v56, %v1649_v47  ;;  %2554 = vpow2.f32 %v2188_v25  ;;  %v1623_v6 = vadd.f32 1.0, %v2533_v43  ;;  %v1665_v25 = vadd.f32 %v2361_v28, %v3217_v17  ;;  %v2365_v47 = vpop.f32.mrf.mxu0 }
 0x41e   : > { %v2535_v39 = vpop.eup %2534  ;;  %2556 = vrcp.f32 %v1555_v57 }
 0x41f   : > { %v2537_v63 = vpop.eup %2536  ;;  %2558 = vtanh.f32 %v1678_v38  ;;  %v1671_v2 = vmul.f32 %v2535_v39, %v1663_v29  ;;  %v1666_v29 = vadd.f32 %v3217_v17, %v1491_v31 }
 0x420   : > { %2560 = vrcp.f32 %v1622_v42  ;;  %v1556_v58 = vadd.f32 1.0, %v2537_v63 }
 0x421   : > { %v1679_v36 = vadd.f32 %v1671_v2, %v1650_v45  ;;  %2562 = vpow2.f32 %v2189_v62  ;;  %v1494_v62 = vpop.f32.mrf.mxu0 }
 0x422   : > { %v2539_v21 = vpop.eup %2538  ;;  %2564 = vrcp.f32 %v1556_v58 }
 0x423   : > { %v2541_v37 = vpop.eup %2540  ;;  %2566 = vtanh.f32 %v1679_v36  ;;  %v1672_v33 = vmul.f32 %v2539_v21, %v1664_v59  ;;  %v3243_v59 = vpop.permute.xlu0 %1751 }
 0x424   : > { %v2543_v52 = vpop.eup %2542  ;;  %v1557_v55 = vadd.f32 1.0, %v2541_v37  ;;  %2568 = vrcp.f32 %v1623_v6  ;;  %vm1774_vm2 = vcmp.eq.s32.totalorder %v3243_v59, 1 }
 0x425   : > { %v2545_v32 = vpop.eup %2544  ;;  %v1680_v19 = vadd.f32 %v1672_v33, %v1651_v7  ;;  %v1694_v63 = vsub.f32 1.0, %v2543_v52  ;;  %v1710_v6 = vmul.f32 %v2543_v52, %v3068_v51  ;;  %v1667_v7 = vadd.f32 %v3217_v17, %v1494_v62 }
 0x426   : > { %v2547_v26 = vpop.eup %2546  ;;  %2570 = vrcp.f32 %v1557_v55  ;;  %v1624_v56 = vadd.f32 1.0, %v2545_v32  ;;  %v3248_v55 = vpop.permute.xlu1 %1754  ;;  %v1669_v62 = vadd.f32 %v2365_v47, %v3217_v17 }
 0x427   : > { %v2549_v60 = vpop.eup %2548  ;;  %2572 = vtanh.f32 %v1680_v19  ;;  %v1673_v46 = vmul.f32 %v2547_v26, %v1665_v25  ;;  %v1654_v19 = vadd.f32 %v3224_v53, %v3197_v54  ;;  %vm1775_vm6 = vcmp.eq.s32.totalorder %v3248_v55, 1 }
 0x428   : > { %v2551_v15 = vpop.eup %2550  ;;  %v1558_v42 = vadd.f32 1.0, %v2549_v60 }
 0x429   : > { %v2553_v57 = vpop.eup %2552  ;;  %v1681_v43 = vadd.f32 %v1673_v46, %v1652_v61  ;;  %v1625_v39 = vadd.f32 1.0, %v2551_v15  ;;  %v1668_v46 = vadd.f32 %v3231_v18, %v3217_v17 }
 0x42a   : > { %v2555_v38 = vpop.eup %2554  ;;  %2574 = vrcp.f32 %v1558_v42  ;;  %v1695_v32 = vsub.f32 1.0, %v2553_v57  ;;  %v1711_v60 = vmul.f32 %v2553_v57, %v3064_v50  ;;  %v3267_v57 = vpop.permute.xlu1 %1757 }
 0x42b   : > { %v2557_v28 = vpop.eup %2556  ;;  %2576 = vtanh.f32 %v1681_v43  ;;  %v1626_v31 = vadd.f32 1.0, %v2555_v38  ;;  %vm1776_vm7 = vcmp.eq.s32.totalorder %v3267_v57, 1 }
 0x42c   : > { %v2559_v45 = vpop.eup %2558  ;;  %v1674_v2 = vmul.f32 %v2557_v28, %v1666_v29  ;;  %2578 = vrcp.f32 %v1624_v56 }
 0x42d   : > { %v2561_v58 = vpop.eup %2560  ;;  %v1702_v36 = vmul.f32 %v2559_v45, %v1694_v63  ;;  %2580 = vrcp.f32 %v1625_v39 }
 0x42e   : > { %v2563_v21 = vpop.eup %2562  ;;  %v1682_v37 = vadd.f32 %v1674_v2, %v1653_v27  ;;  %v1696_v43 = vsub.f32 1.0, %v2561_v58  ;;  %v1712_v28 = vmul.f32 %v2561_v58, %v3118_v16  ;;  %v1656_v2 = vadd.f32 %v3193_v34, %v3224_v53  ;;  %v1761_v16 = vpop.permute.xlu0 %1760 }
 0x42f   : > { %v2565_v33 = vpop.eup %2564  ;;  %v3250_v30 = vadd.f32 %v1710_v6, %v1702_v36  ;;  %v1627_v56 = vadd.f32 1.0, %v2563_v21  ;;  %vm1777_vm8 = vcmp.eq.s32.totalorder %v1761_v16, 1 }
 0x430   : > { %v2567_v25 = vpop.eup %2566  ;;  %2582 = vtanh.f32 %v1682_v37  ;;  %v1675_v51 = vmul.f32 %v2565_v33, %v1667_v7  ;;  %v1764_v33 = vpop.permute.xlu1 %1763 }
 0x431   : > { %v1878_v52 = vsel %vm1774_vm2, %v3250_v30, %v3031_v9  ;;  %v1703_v26 = vmul.f32 %v2567_v25, %v1695_v32  ;;  %v2569_v61 = vpop.eup %2568  ;;  %2584 = vrcp.f32 %v1626_v31  ;;  %v1655_v9 = vadd.f32 %v3185_v48, %v3224_v53 }
 0x432   : > { %v1683_v15 = vadd.f32 %v1675_v51, %v1654_v19  ;;  %1894 = vrot.lane.b32.xlu1 %v1878_v52, %s2654_s14  ;;  %v1697_v45 = vsub.f32 1.0, %v2569_v61  ;;  %v1713_v58 = vmul.f32 %v2569_v61, %v3114_v14  ;;  %vm1778_vm9 = vcmp.eq.s32.totalorder %v1764_v33, 1 }
 0x433   : > { %v2571_v54 = vpop.eup %2570  ;;  %v3263_v42 = vadd.f32 %v1711_v60, %v1703_v26  ;;  %v1767_v60 = vpop.permute.xlu0 %1766 }
 0x434   : > { %v2573_v38 = vpop.eup %2572  ;;  %2586 = vtanh.f32 %v1683_v15  ;;  %v1676_v50 = vmul.f32 %v2571_v54, %v1668_v46  ;;  %vm1779_vm10 = vcmp.eq.s32.totalorder %v1767_v60, 1 }
 0x435   : > { %v1879_v18 = vsel %vm1775_vm6, %v3263_v42, %v3029_v11  ;;  %v1704_v29 = vmul.f32 %v2573_v38, %v1696_v43  ;;  %2588 = vrcp.f32 %v1627_v56 }
 0x436   : > { %v1684_v39 = vadd.f32 %v1676_v50, %v1655_v9  ;;  %1896 = vrot.lane.b32.xlu0 %v1879_v18, %s2654_s14 }
 0x437   : > { %v2575_v48 = vpop.eup %2574  ;;  %v3277_v63 = vadd.f32 %v1712_v28, %v1704_v29 }
 0x438   : > { %v2577_v27 = vpop.eup %2576  ;;  %2590 = vtanh.f32 %v1684_v39  ;;  %v1677_v11 = vmul.f32 %v2575_v48, %v1669_v62 }
 0x439   : > { %v2579_v36 = vpop.eup %2578  ;;  %v1880_v17 = vsel %vm1776_vm7, %v3277_v63, %v3046_v23  ;;  %v1705_v47 = vmul.f32 %v2577_v27, %v1697_v45 }
 0x43a   : > { %v1685_v6 = vadd.f32 %v1677_v11, %v1656_v2  ;;  %1898 = vrot.lane.b32.xlu1 %v1880_v17, %s2654_s14  ;;  %v2581_v37 = vpop.eup %2580  ;;  %v1698_v34 = vsub.f32 1.0, %v2579_v36  ;;  %v1714_v14 = vmul.f32 %v2579_v36, %v3110_v41 }
 0x43b   : > { %v3287_v21 = vadd.f32 %v1713_v58, %v1705_v47  ;;  %v1699_v25 = vsub.f32 1.0, %v2581_v37  ;;  %v1715_v26 = vmul.f32 %v2581_v37, %v3106_v35 }
 0x43c   : > { %2592 = vtanh.f32 %v1685_v6 }
 0x43d   : > { %v2583_v53 = vpop.eup %2582  ;;  %v1881_v7 = vsel %vm1777_vm8, %v3287_v21, %v3044_v20 }
 0x43e   : > { %1900 = vrot.lane.b32.xlu0 %v1881_v7, %s2654_s14  ;;  %v1706_v23 = vmul.f32 %v2583_v53, %v1698_v34  ;;  %v2585_v31 = vpop.eup %2584 }
 0x43f   : > { %v1700_v41 = vsub.f32 1.0, %v2585_v31  ;;  %v1716_v56 = vmul.f32 %v2585_v31, %v3144_v5  ;;  %v1782_v5 = vsel %vm1774_vm2, %v3250_v30, %v3027_v4 }
 0x440   : > { %v3294_v32 = vadd.f32 %v1714_v14, %v1706_v23 }
 0x441   : > { %v2587_v19 = vpop.eup %2586 }
 0x442   : > { %v1882_v51 = vsel %vm1778_vm9, %v3294_v32, %v3078_v8  ;;  %v1707_v52 = vmul.f32 %v2587_v19, %v1699_v25  ;;  %v2589_v20 = vpop.eup %2588  ;;  %v1770_v8 = vpop.permute.xlu1 %1769  ;;  %v1786_v4 = vsel %vm1778_vm9, %v3294_v32, %v3058_v44 }
 0x443   : > { %1902 = vrot.lane.b32.xlu1 %v1882_v51, %s2654_s14  ;;  %v1701_v43 = vsub.f32 1.0, %v2589_v20  ;;  %vm1780_vm11 = vcmp.eq.s32.totalorder %v1770_v8, 1  ;;  %v1717_v18 = vmul.f32 %v2589_v20, %v3140_v3  ;;  %v1783_v3 = vsel %vm1775_vm6, %v3263_v42, %v3025_v0 }
 0x444   : > { %v3301_v61 = vadd.f32 %v1715_v26, %v1707_v52 }
 0x445   : > { %v2591_v46 = vpop.eup %2590 }
 0x446   : > { %v1883_v15 = vsel %vm1779_vm10, %v3301_v61, %v3076_v10  ;;  %v1708_v54 = vmul.f32 %v2591_v46, %v1700_v41  ;;  %v1773_v10 = vpop.permute.xlu0 %1772  ;;  %v1800_v44 = vpop.permute.xlu1 %1799 }
 0x447   : > { %1904 = vrot.lane.b32.xlu0 %v1883_v15, %s2654_s14  ;;  %vm1781_vm12 = vcmp.eq.s32.totalorder %v1773_v10, 1  ;;  %vm1822_vm13 = vcmp.eq.s32.totalorder %v1800_v44, 1 }
 0x448   : > { %v3308_v35 = vadd.f32 %v1716_v56, %v1708_v54 }
 0x449   : > { %v2593_v38 = vpop.eup %2592 }
 0x44a   : > { %v1884_v9 = vsel %vm1780_vm11, %v3308_v35, %v3134_v1  ;;  %v1709_v50 = vmul.f32 %v2593_v38, %v1701_v43  ;;  %v1784_v1 = vsel %vm1776_vm7, %v3277_v63, %v3035_v13  ;;  %v1788_v0 = vsel %vm1780_vm11, %v3308_v35, %v3083_v24  ;;  %v1803_v59 = vpop.permute.xlu0 %1802  ;;  %v1806_v55 = vpop.permute.xlu1 %1805 }
 0x44b   : > { %1906 = vrot.lane.b32.xlu1 %v1884_v9, %s2654_s14  ;;  %v1787_v13 = vsel %vm1779_vm10, %v3301_v61, %v3054_v40  ;;  %vm1823_vm14 = vcmp.eq.s32.totalorder %v1803_v59, 1  ;;  %vm1824_vm15 = vcmp.eq.s32.totalorder %v1806_v55, 1 }
 0x44c   : > { %v3315_v29 = vadd.f32 %v1717_v18, %v1709_v50 }
 0x44e   : > { %v1885_v28 = vsel %vm1781_vm12, %v3315_v29, %v3132_v49  ;;  %v1785_v49 = vsel %vm1777_vm8, %v3287_v21, %v3033_v12  ;;  %v1789_v12 = vsel %vm1781_vm12, %v3315_v29, %v3081_v22  ;;  %v1809_v57 = vpop.permute.xlu0 %1808  ;;  %v1812_v62 = vpop.permute.xlu1 %1811 }
 0x44f   : > { %1838 = vrot.lane.b32.xlu1 %v1782_v5, %s2654_s14  ;;  %1908 = vrot.lane.b32.xlu0 %v1885_v28, %s2654_s14  ;;  %vm1825_vm0 = vcmp.eq.s32.totalorder %v1809_v57, 1  ;;  %vm1826_vm3 = vcmp.eq.s32.totalorder %v1812_v62, 1 }
 0x452   : > { %v1815_v24 = vpop.permute.xlu0 %1814  ;;  %v1818_v39 = vpop.permute.xlu1 %1817 }
 0x453   : > { %1842 = vrot.lane.b32.xlu1 %v1784_v1, %s2654_s14  ;;  %1840 = vrot.lane.b32.xlu0 %v1783_v3, %s2654_s14  ;;  %vm1827_vm4 = vcmp.eq.s32.totalorder %v1815_v24, 1  ;;  %vm1828_vm5 = vcmp.eq.s32.totalorder %v1818_v39, 1 }
 0x456   : > { %v1821_v48 = vpop.permute.xlu0 %1820 }
 0x457   : > { %1846 = vrot.lane.b32.xlu1 %v1786_v4, %s2654_s14  ;;  %1844 = vrot.lane.b32.xlu0 %v1785_v49, %s2654_s14  ;;  %vm1829_vm2 = vcmp.eq.s32.totalorder %v1821_v48, 1 }
 0x45b   : > { %1850 = vrot.lane.b32.xlu1 %v1788_v0, %s2654_s14  ;;  %1848 = vrot.lane.b32.xlu0 %v1787_v13, %s2654_s14 }
 0x45f   : > { %1852 = vrot.lane.b32.xlu0 %v1789_v12, %s2654_s14 }
 0x4a4   : > { %v1895_v40 = vpop.permute.xlu1 %1894 }
 0x4a5   : > { %v1918_v45 = vsel %vm1822_vm13, %v3250_v30, %v1895_v40 }
 0x4a6   : > { %1934 = vrot.lane.b32.xlu1 %v1918_v45, %s2653_s13 }
 0x4a8   : > { %v1897_v27 = vpop.permute.xlu0 %1896 }
 0x4a9   : > { %v1919_v22 = vsel %vm1823_vm14, %v3263_v42, %v1897_v27 }
 0x4aa   : > { %1936 = vrot.lane.b32.xlu0 %v1919_v22, %s2653_s13 }
 0x4ac   : > { %v1899_v2 = vpop.permute.xlu1 %1898 }
 0x4ad   : > { %v1920_v11 = vsel %vm1824_vm15, %v3277_v63, %v1899_v2 }
 0x4ae   : > { %1938 = vrot.lane.b32.xlu1 %v1920_v11, %s2653_s13 }
 0x4b0   : > { %v1901_v36 = vpop.permute.xlu0 %1900 }
 0x4b1   : > { %v1921_v16 = vsel %vm1825_vm0, %v3287_v21, %v1901_v36 }
 0x4b2   : > { %1940 = vrot.lane.b32.xlu0 %v1921_v16, %s2653_s13 }
 0x4b5   : > { %v1903_v17 = vpop.permute.xlu1 %1902 }
 0x4b6   : > { %v1922_v47 = vsel %vm1826_vm3, %v3294_v32, %v1903_v17 }
 0x4b7   : > { %1942 = vrot.lane.b32.xlu1 %v1922_v47, %s2653_s13 }
 0x4b9   : > { %v1905_v58 = vpop.permute.xlu0 %1904 }
 0x4ba   : > { %v1923_v6 = vsel %vm1827_vm4, %v3301_v61, %v1905_v58 }
 0x4bb   : > { %1944 = vrot.lane.b32.xlu0 %v1923_v6, %s2653_s13 }
 0x4bd   : > { %v1907_v37 = vpop.permute.xlu1 %1906 }
 0x4be   : > { %v1924_v34 = vsel %vm1828_vm5, %v3308_v35, %v1907_v37 }
 0x4bf   : > { %1946 = vrot.lane.b32.xlu1 %v1924_v34, %s2653_s13 }
 0x4c1   : > { %v1839_v53 = vpop.permute.xlu1 %1838  ;;  %v1909_v7 = vpop.permute.xlu0 %1908 }
 0x4c2   : > { %v1862_v33 = vsel %vm1822_vm13, %v3250_v30, %v1839_v53  ;;  %v1925_v23 = vsel %vm1829_vm2, %v3315_v29, %v1909_v7 }
 0x4c3   : > { %1870 = vst.msk [vmem:[%s3473_s4] sm:$0xff] %vm377_vm1, %v1862_v33  ;;  %1948 = vrot.lane.b32.xlu0 %v1925_v23, %s2653_s13 }
 0x4c5   : > { %v1843_v14 = vpop.permute.xlu1 %1842  ;;  %v1841_v31 = vpop.permute.xlu0 %1840 }
 0x4c6   : > { %v1864_v25 = vsel %vm1824_vm15, %v3277_v63, %v1843_v14  ;;  %v1863_v19 = vsel %vm1823_vm14, %v3263_v42, %v1841_v31 }
 0x4c7   : > { %1872 = vst.msk [vmem:[%s3473_s4 + $0x10] sm:$0xff] %vm377_vm1, %v1864_v25  ;;  %1871 = vst.msk [vmem:[%s3473_s4 + $0x8] sm:$0xff] %vm377_vm1, %v1863_v19 }
 0x4c9   : > { %v1847_v30 = vpop.permute.xlu1 %1846  ;;  %v1845_v51 = vpop.permute.xlu0 %1844 }
 0x4ca   : > { %v1866_v52 = vsel %vm1826_vm3, %v3294_v32, %v1847_v30  ;;  %v1865_v63 = vsel %vm1825_vm0, %v3287_v21, %v1845_v51 }
 0x4cb   : > { %1874 = vst.msk [vmem:[%s3473_s4 + $0x20] sm:$0xff] %vm377_vm1, %v1866_v52  ;;  %1873 = vst.msk [vmem:[%s3473_s4 + $0x18] sm:$0xff] %vm377_vm1, %v1865_v63 }
 0x4cd   : > { %v1851_v42 = vpop.permute.xlu1 %1850  ;;  %v1849_v26 = vpop.permute.xlu0 %1848 }
 0x4ce   : > { %v1868_v20 = vsel %vm1828_vm5, %v3308_v35, %v1851_v42  ;;  %v1867_v32 = vsel %vm1827_vm4, %v3301_v61, %v1849_v26 }
 0x4cf   : > { %1876 = vst.msk [vmem:[%s3473_s4 + $0x30] sm:$0xff] %vm377_vm1, %v1868_v20  ;;  %1875 = vst.msk [vmem:[%s3473_s4 + $0x28] sm:$0xff] %vm377_vm1, %v1867_v32 }
 0x4d1   : > { %v1853_v21 = vpop.permute.xlu0 %1852 }
 0x4d2   : > { %v1869_v60 = vsel %vm1829_vm2, %v3315_v29, %v1853_v21 }
 0x4d3   : > { %1877 = vst.msk [vmem:[%s3473_s4 + $0x38] sm:$0xff] %vm377_vm1, %v1869_v60 }
 0x518   : > { %v1935_v61 = vpop.permute.xlu1 %1934 }
 0x519   : > { %1958 = vst.msk [vmem:[%s3474_s5] sm:$0xff] %vm377_vm1, %v1935_v61 }
 0x51c   : > { %v1937_v41 = vpop.permute.xlu0 %1936 }
 0x51d   : > { %1959 = vst.msk [vmem:[%s3474_s5 + $0x8] sm:$0xff] %vm377_vm1, %v1937_v41 }
 0x520   : > { %v1939_v46 = vpop.permute.xlu1 %1938 }
 0x521   : > { %1960 = vst.msk [vmem:[%s3474_s5 + $0x10] sm:$0xff] %vm377_vm1, %v1939_v46 }
 0x524   : > { %v1941_v15 = vpop.permute.xlu0 %1940 }
 0x525   : > { %1961 = vst.msk [vmem:[%s3474_s5 + $0x18] sm:$0xff] %vm377_vm1, %v1941_v15 }
 0x529   : > { %v1943_v54 = vpop.permute.xlu1 %1942 }
 0x52a   : > { %1962 = vst.msk [vmem:[%s3474_s5 + $0x20] sm:$0xff] %vm377_vm1, %v1943_v54 }
 0x52d   : > { %v1945_v56 = vpop.permute.xlu0 %1944 }
 0x52e   : > { %1963 = vst.msk [vmem:[%s3474_s5 + $0x28] sm:$0xff] %vm377_vm1, %v1945_v56 }
 0x531   : > { %v1947_v8 = vpop.permute.xlu1 %1946 }
 0x532   : > { %1964 = vst.msk [vmem:[%s3474_s5 + $0x30] sm:$0xff] %vm377_vm1, %v1947_v8 }
 0x535   : > { %v1949_v35 = vpop.permute.xlu0 %1948 }
 0x536   : > { %1965 = vst.msk [vmem:[%s3474_s5 + $0x38] sm:$0xff] %vm377_vm1, %v1949_v35 }
 0x537 PF: > { %s17_s20 = sadd.s32 1, %s2646_s20   ;;  %s3477_s18 = smov %s2642_s19 }
 0x538   : > { %p14_p2 = scmp.ge.s32.totalorder %s17_s20, 4   ;;  %s3478_s19 = smov %s3480_s22 }
 0x53a   :  { %16 = sbr.rel (!%p14_p2) target bundleno = 2 (0x2), region = 90 }
 0x53f   :  { %2005 = vsyncpa [#allocation3], 1 }
 0x540   :  { %2007 = vsyncpa [#allocation3 + $0x1], 1 }

</bundles_post_ra>
